<compile_context>
chip_gen: v7x
topology: tpu7x:2x2x1
jax: 0.10.0
libtpu: 0.0.40
codegen_flags: <defaults>
</compile_context>

<pallas_src>
import functools

import jax
import jax.numpy as jnp
from jax.experimental import pallas as pl
from jax.experimental.pallas import tpu as pltpu


def _pick_group_size(num_heads, head_dim, seq_len):
    """Heads processed per grid step: wide enough for the MXU, bounded by VMEM."""
    target = max(1, 256 // head_dim)                       # G*hd >= 128-256 lanes of work
    cap = max(1, (8 * 1024 * 1024) // max(4 * seq_len * seq_len, 1))  # (G,N,N) f32 <= ~8MiB
    target = max(1, min(target, cap, num_heads))
    best = 1
    for d in range(1, num_heads + 1):
        if num_heads % d == 0 and d <= target:
            best = d
    return best


def _vmem_limit_bytes(N, C, G, hd, c_itemsize, out_itemsize):
    """Shape-derived scoped-VMEM budget, capped at 75% of physical VMEM."""
    est = (
        2 * N * C * c_itemsize            # x block (double-buffered)
        + 2 * N * C * out_itemsize        # out block (double-buffered)
        + 2 * 4 * C * C * c_itemsize      # resident qkv + proj weights (2x slack)
        + N * C * 4                       # f32 accumulator scratch
        + 2 * G * N * N * 4               # scores + exp (f32)
        + 3 * G * hd * N * (4 + c_itemsize)  # fused qkv intermediate + casts
        + 2 * G * N * hd * 4              # pv / normalized head outputs
        + 2 * N * C * 4                   # projection partial sums headroom
    )
    est = int(est * 1.25) + (1 << 20)
    try:
        cap = int(pltpu.get_tpu_info().vmem_capacity_bytes) * 3 // 4
    except Exception:  # info query unavailable -> conservative (v7x-safe) cap
        cap = 48 * 1024 * 1024
    return max(32 * 1024 * 1024, min(est, cap))


def _attention_kernel(x_ref, w_in_ref, w_proj_ref, b_ref, o_ref, *scratch,
                      G, num_groups, compute_dtype):
    g = pl.program_id(1)
    cdt = compute_dtype
    N, _ = x_ref.shape
    hd = w_proj_ref.shape[2]

    x = x_ref[...]                                            # (N, C), compute dtype

    # ---- fused Q/K/V projection for this head group (one wide MXU matmul) ----
    w_blk = w_in_ref[g]                                       # (3*G*hd, C), resident weights
    qkv = jax.lax.dot_general(w_blk, x, (((1,), (1,)), ((), ())),
                              preferred_element_type=jnp.float32)   # (3*G*hd, N) f32
    qkv = qkv.reshape(3, G, hd, N)                            # leading-axis split: q/k/v, heads
    q = jnp.swapaxes(qkv[0], 1, 2).astype(cdt)                # (G, N, hd); scale folded into Wq
    k = qkv[1].astype(cdt)                                    # (G, hd, N)
    v = qkv[2].astype(cdt)                                    # (G, hd, N)

    # ---- scores + softmax (f32 math; normalization deferred past PV matmul) ----
    s = jnp.einsum('gnd,gdm->gnm', q, k,
                   preferred_element_type=jnp.float32)        # (G, N, N) f32
    # TODO(synk): optional mask (masked_fill with -inf) would be applied to `s` here.
    p = jnp.exp(s - jnp.max(s, axis=-1, keepdims=True))
    denom = jnp.sum(p, axis=-1, keepdims=True)                # (G, N, 1) f32

    pv = jnp.einsum('gnm,gdm->gnd', p.astype(cdt), v,
                    preferred_element_type=jnp.float32)       # (G, N, hd) f32
    out_g = (pv * pl.reciprocal(denom, approx=True)).astype(cdt)   # (G, N, hd)

    # ---- output projection: head concat folded into an accumulated sum ----
    wp = w_proj_ref[g]                                        # (G, hd, C), resident weights
    y = jnp.dot(out_g[0], wp[0], preferred_element_type=jnp.float32)   # (N, C) f32
    for i in range(1, G):
        y = y + jnp.dot(out_g[i], wp[i], preferred_element_type=jnp.float32)

    if num_groups == 1:
        # All heads handled in this step: write the output directly (no extra
        # (N, C) f32 scratch round-trip -- matters for v5e's single store slot).
        o_ref[...] = (y + b_ref[...].astype(jnp.float32)).astype(o_ref.dtype)
    else:
        acc_ref = scratch[0]

        @pl.when(g == 0)
        def _():
            acc_ref[...] = jnp.broadcast_to(
                b_ref[...].astype(jnp.float32), acc_ref.shape)

        acc_ref[...] += y

        @pl.when(g == num_groups - 1)
        def _():
            o_ref[...] = acc_ref[...].astype(o_ref.dtype)


def attention_pallas(x, w_qkv, w_proj, b_proj, *, num_heads, qk_scale=None,
                     compute_dtype=jnp.bfloat16, mask=None):
    assert mask is None, "attention mask path is not implemented"  # TODO(synk)
    B, N, C = x.shape
    assert C % num_heads == 0, "dim must be divisible by num_heads"
    hd = C // num_heads
    assert N % 8 == 0 and C % 128 == 0, "expect N % 8 == 0 and C % 128 == 0"
    assert hd % 8 == 0, "head_dim must be a multiple of 8"
    scale = qk_scale if qk_scale is not None else hd ** (-0.5)

    H = num_heads
    G = _pick_group_size(H, hd, N)
    num_groups = H // G
    orig_dtype = x.dtype
    cdt = compute_dtype

    # ---- one-time weight prep (wrapper / XLA side) ----
    w_qkv = w_qkv.astype(jnp.float32)
    wq_h = (w_qkv[0 * C:1 * C] * scale).reshape(H, hd, C)     # scale folded into Wq
    wk_h = w_qkv[1 * C:2 * C].reshape(H, hd, C)
    wv_h = w_qkv[2 * C:3 * C].reshape(H, hd, C)
    w_in = (jnp.stack([wq_h, wk_h, wv_h], axis=0)             # (3, H, hd, C)
            .reshape(3, num_groups, G, hd, C)
            .transpose(1, 0, 2, 3, 4)
            .reshape(num_groups, 3 * G * hd, C)
            .astype(cdt))
    # Output projection grouped per head: y_h = out_h @ W_proj[:, h*hd:(h+1)*hd].T
    w_proj_heads = (w_proj.astype(jnp.float32)
                    .reshape(C, H, hd).transpose(1, 2, 0)     # (H, hd, C)
                    .reshape(num_groups, G, hd, C)
                    .astype(cdt))
    b = jnp.asarray(b_proj, jnp.float32).reshape(1, C)

    x_in = x.astype(cdt)                                      # bf16 MXU feed + halved x DMA

    kernel = functools.partial(_attention_kernel, G=G, num_groups=num_groups,
                               compute_dtype=cdt)
    vmem_limit = _vmem_limit_bytes(N, C, G, hd,
                                   jnp.dtype(cdt).itemsize,
                                   jnp.dtype(orig_dtype).itemsize)
    scratch = [pltpu.VMEM((N, C), jnp.float32)] if num_groups > 1 else []

    return pl.pallas_call(
        kernel,
        out_shape=jax.ShapeDtypeStruct((B, N, C), orig_dtype),
        grid_spec=pltpu.PrefetchScalarGridSpec(
            num_scalar_prefetch=0,
            grid=(B, num_groups),
            in_specs=[
                pl.BlockSpec((None, N, C), lambda bb, gg: (bb, 0, 0)),       # x (batch-squeezed)
                pl.BlockSpec((num_groups, 3 * G * hd, C),
                             lambda bb, gg: (0, 0, 0)),                       # fused qkv weights (resident)
                pl.BlockSpec((num_groups, G, hd, C),
                             lambda bb, gg: (0, 0, 0, 0)),                    # proj weights (resident)
                pl.BlockSpec((1, C), lambda bb, gg: (0, 0)),                  # proj bias (resident)
            ],
            out_specs=pl.BlockSpec((None, N, C), lambda bb, gg: (bb, 0, 0)),
            scratch_shapes=scratch,
        ),
        compiler_params=pltpu.CompilerParams(
            dimension_semantics=("parallel", "arbitrary"),
            vmem_limit_bytes=vmem_limit,
        ),
    )(x_in, w_in, w_proj_heads, b)


def attention_ref(x, w_qkv, w_proj, b_proj, *, num_heads, qk_scale=None):
    """Pure-JAX reference mirroring the PyTorch forward exactly (f32)."""
    B, N, C = x.shape
    hd = C // num_heads
    scale = qk_scale if qk_scale is not None else hd ** (-0.5)
    qkv = x @ w_qkv.T                                        # (B, N, 3C)
    qkv = qkv.reshape(B, N, 3, num_heads, hd).transpose(2, 0, 3, 1, 4)
    q, k, v = qkv[0], qkv[1], qkv[2]                         # (B, H, N, hd)
    q = q * scale
    attn = jax.nn.softmax(q @ jnp.swapaxes(k, -2, -1), axis=-1)
    out = (attn @ v).transpose(0, 2, 1, 3).reshape(B, N, C)
    return out @ w_proj.T + jnp.asarray(b_proj).reshape(1, C)


if __name__ == "__main__":
    # Small but lane/sublane-aligned shapes: C % 128 == 0, N % 8 == 0.
    B, N, C = 2, 16, 128
    num_heads = 8

    key = jax.random.PRNGKey(0)
    kx, kw1, kw2, kb = jax.random.split(key, 4)

    x = jax.random.normal(kx, (B, N, C), dtype=jnp.float32)
    # nn.Linear(dim, 3*dim, bias=False): weight (3C, C)
    w_qkv = jax.random.normal(kw1, (3 * C, C), dtype=jnp.float32) * 0.05
    # nn.Linear(dim, dim): weight (C, C), bias (C,)
    w_proj = jax.random.normal(kw2, (C, C), dtype=jnp.float32) * 0.05
    b_proj = jax.random.normal(kb, (C,), dtype=jnp.float32) * 0.05

    out = attention_pallas(x, w_qkv, w_proj, b_proj, num_heads=num_heads)
    out = jax.block_until_ready(out)

    ref = attention_ref(x, w_qkv, w_proj, b_proj, num_heads=num_heads)
    assert out.shape == (B, N, C) and out.dtype == x.dtype
    err = float(jnp.max(jnp.abs(out - ref)))
    # Tolerance covers bf16 MXU operands + the EUP approximate reciprocal.
    assert jnp.allclose(out, ref, atol=2e-2, rtol=2e-2), f"max abs err = {err}"

    print("KERNEL_OK")
</pallas_src>

<mosaic_0001>
module attributes {stable_mosaic.version = 11 : i64} {
  func.func @_attention_kernel(%arg0: i32, %arg1: i32, %arg2: memref<1x16x128xbf16, #tpu.memory_space<vmem>>, %arg3: memref<1x384x128xbf16, #tpu.memory_space<vmem>>, %arg4: memref<1x8x16x128xbf16, #tpu.memory_space<vmem>>, %arg5: memref<1x128xf32, #tpu.memory_space<vmem>>, %arg6: memref<1x16x128xf32, #tpu.memory_space<vmem>>) attributes {dimension_semantics = [#tpu.dimension_semantics<parallel>, #tpu.dimension_semantics<arbitrary>], iteration_bounds = array<i64: 2, 1>, scalar_prefetch = 0 : i64, scratch_operands = 0 : i64, tpu.core_type = #tpu.core_type<tc>, window_params = [{transform_indices = @transform_0, window_bounds = array<i64: 1, 16, 128>}, {pipeline_mode = #tpu.pipeline_mode<synchronous>, transform_indices = @transform_1, window_bounds = array<i64: 1, 384, 128>}, {pipeline_mode = #tpu.pipeline_mode<synchronous>, transform_indices = @transform_2, window_bounds = array<i64: 1, 8, 16, 128>}, {pipeline_mode = #tpu.pipeline_mode<synchronous>, transform_indices = @transform_3, window_bounds = array<i64: 1, 128>}, {transform_indices = @transform_4, window_bounds = array<i64: 1, 16, 128>}]} {
    %c0 = arith.constant 0 : index
    %c0_0 = arith.constant 0 : index
    %c0_1 = arith.constant 0 : index
    %0 = vector.load %arg2[%c0, %c0_0, %c0_1] : memref<1x16x128xbf16, #tpu.memory_space<vmem>>, vector<1x16x128xbf16>
    %1 = vector.shape_cast %0 : vector<1x16x128xbf16> to vector<16x128xbf16>
    %2 = arith.index_cast %arg1 : i32 to index
    %c0_2 = arith.constant 0 : index
    %c0_3 = arith.constant 0 : index
    %3 = vector.load %arg3[%2, %c0_2, %c0_3] : memref<1x384x128xbf16, #tpu.memory_space<vmem>>, vector<1x384x128xbf16>
    %4 = vector.shape_cast %3 : vector<1x384x128xbf16> to vector<384x128xbf16>
    %cst = arith.constant dense<0.000000e+00> : vector<384x16xf32>
    %5 = tpu.matmul %4, %1, %cst {dimension_numbers = #tpu.dot_dimension_numbers<[1], [1], [0], [0], [0, 0, 1, 0], [], []>} : vector<384x128xbf16>, vector<16x128xbf16>, vector<384x16xf32> -> vector<384x16xf32>
    %6 = vector.shape_cast %5 : vector<384x16xf32> to vector<3x8x16x16xf32>
    %7 = vector.extract_strided_slice %6 {offsets = [0, 0, 0, 0], sizes = [1, 8, 16, 16], strides = [1, 1, 1, 1]} : vector<3x8x16x16xf32> to vector<1x8x16x16xf32>
    %8 = vector.shape_cast %7 : vector<1x8x16x16xf32> to vector<8x16x16xf32>
    %9 = tpu.transpose %8, [0, 2, 1] : vector<8x16x16xf32> -> vector<8x16x16xf32>
    %10 = arith.truncf %9 : vector<8x16x16xf32> to vector<8x16x16xbf16>
    %11 = vector.extract_strided_slice %6 {offsets = [1, 0, 0, 0], sizes = [1, 8, 16, 16], strides = [1, 1, 1, 1]} : vector<3x8x16x16xf32> to vector<1x8x16x16xf32>
    %12 = vector.shape_cast %11 : vector<1x8x16x16xf32> to vector<8x16x16xf32>
    %13 = arith.truncf %12 : vector<8x16x16xf32> to vector<8x16x16xbf16>
    %14 = vector.extract_strided_slice %6 {offsets = [2, 0, 0, 0], sizes = [1, 8, 16, 16], strides = [1, 1, 1, 1]} : vector<3x8x16x16xf32> to vector<1x8x16x16xf32>
    %15 = vector.shape_cast %14 : vector<1x8x16x16xf32> to vector<8x16x16xf32>
    %16 = arith.truncf %15 : vector<8x16x16xf32> to vector<8x16x16xbf16>
    "tpu.trace_start"() <{level = 10 : i32, message = "gnd,gdm->gnm"}> : () -> ()
    %cst_4 = arith.constant dense<0.000000e+00> : vector<8x16x16xf32>
    %17 = tpu.matmul %10, %13, %cst_4 {dimension_numbers = #tpu.dot_dimension_numbers<[2], [1], [1], [2], [0, 0, 0, 1, 1, 2], [0], [0]>} : vector<8x16x16xbf16>, vector<8x16x16xbf16>, vector<8x16x16xf32> -> vector<8x16x16xf32>
    "tpu.trace_stop"() : () -> ()
    %cst_5 = arith.constant dense<0xFF800000> : vector<8x16xf32>
    %18 = vector.multi_reduction <maximumf>, %17, %cst_5 [2] : vector<8x16x16xf32> to vector<8x16xf32>
    %19 = vector.shape_cast %18 : vector<8x16xf32> to vector<8x16x1xf32>
    %20 = vector.broadcast %19 : vector<8x16x1xf32> to vector<8x16x16xf32>
    %21 = arith.subf %17, %20 : vector<8x16x16xf32>
    %22 = math.exp %21 : vector<8x16x16xf32>
    %cst_6 = arith.constant dense<0.000000e+00> : vector<8x16xf32>
    %23 = vector.multi_reduction <add>, %22, %cst_6 [2] : vector<8x16x16xf32> to vector<8x16xf32>
    %24 = vector.shape_cast %23 : vector<8x16xf32> to vector<8x16x1xf32>
    %25 = arith.truncf %22 : vector<8x16x16xf32> to vector<8x16x16xbf16>
    "tpu.trace_start"() <{level = 10 : i32, message = "gnm,gdm->gnd"}> : () -> ()
    %cst_7 = arith.constant dense<0.000000e+00> : vector<8x16x16xf32>
    %26 = tpu.matmul %25, %16, %cst_7 {dimension_numbers = #tpu.dot_dimension_numbers<[2], [2], [1], [1], [0, 0, 0, 1, 1, 1], [0], [0]>} : vector<8x16x16xbf16>, vector<8x16x16xbf16>, vector<8x16x16xf32> -> vector<8x16x16xf32>
    "tpu.trace_stop"() : () -> ()
    %27 = tpu.reciprocal %24 {approx = true} : vector<8x16x1xf32> -> vector<8x16x1xf32>
    %28 = vector.broadcast %27 : vector<8x16x1xf32> to vector<8x16x16xf32>
    %29 = arith.mulf %26, %28 : vector<8x16x16xf32>
    %30 = arith.truncf %29 : vector<8x16x16xf32> to vector<8x16x16xbf16>
    %31 = arith.index_cast %arg1 : i32 to index
    %c0_8 = arith.constant 0 : index
    %c0_9 = arith.constant 0 : index
    %c0_10 = arith.constant 0 : index
    %32 = vector.load %arg4[%31, %c0_8, %c0_9, %c0_10] : memref<1x8x16x128xbf16, #tpu.memory_space<vmem>>, vector<1x8x16x128xbf16>
    %33 = vector.shape_cast %32 : vector<1x8x16x128xbf16> to vector<8x16x128xbf16>
    %34 = vector.extract_strided_slice %30 {offsets = [0, 0, 0], sizes = [1, 16, 16], strides = [1, 1, 1]} : vector<8x16x16xbf16> to vector<1x16x16xbf16>
    %35 = vector.shape_cast %34 : vector<1x16x16xbf16> to vector<16x16xbf16>
    %36 = vector.extract_strided_slice %33 {offsets = [0, 0, 0], sizes = [1, 16, 128], strides = [1, 1, 1]} : vector<8x16x128xbf16> to vector<1x16x128xbf16>
    %37 = vector.shape_cast %36 : vector<1x16x128xbf16> to vector<16x128xbf16>
    %cst_11 = arith.constant dense<0.000000e+00> : vector<16x128xf32>
    %38 = tpu.matmul %35, %37, %cst_11 {dimension_numbers = #tpu.dot_dimension_numbers<[1], [0], [0], [1], [0, 0, 1, 1], [], []>} : vector<16x16xbf16>, vector<16x128xbf16>, vector<16x128xf32> -> vector<16x128xf32>
    %39 = vector.extract_strided_slice %30 {offsets = [1, 0, 0], sizes = [1, 16, 16], strides = [1, 1, 1]} : vector<8x16x16xbf16> to vector<1x16x16xbf16>
    %40 = vector.shape_cast %39 : vector<1x16x16xbf16> to vector<16x16xbf16>
    %41 = vector.extract_strided_slice %33 {offsets = [1, 0, 0], sizes = [1, 16, 128], strides = [1, 1, 1]} : vector<8x16x128xbf16> to vector<1x16x128xbf16>
    %42 = vector.shape_cast %41 : vector<1x16x128xbf16> to vector<16x128xbf16>
    %cst_12 = arith.constant dense<0.000000e+00> : vector<16x128xf32>
    %43 = tpu.matmul %40, %42, %cst_12 {dimension_numbers = #tpu.dot_dimension_numbers<[1], [0], [0], [1], [0, 0, 1, 1], [], []>} : vector<16x16xbf16>, vector<16x128xbf16>, vector<16x128xf32> -> vector<16x128xf32>
    %44 = arith.addf %38, %43 : vector<16x128xf32>
    %45 = vector.extract_strided_slice %30 {offsets = [2, 0, 0], sizes = [1, 16, 16], strides = [1, 1, 1]} : vector<8x16x16xbf16> to vector<1x16x16xbf16>
    %46 = vector.shape_cast %45 : vector<1x16x16xbf16> to vector<16x16xbf16>
    %47 = vector.extract_strided_slice %33 {offsets = [2, 0, 0], sizes = [1, 16, 128], strides = [1, 1, 1]} : vector<8x16x128xbf16> to vector<1x16x128xbf16>
    %48 = vector.shape_cast %47 : vector<1x16x128xbf16> to vector<16x128xbf16>
    %cst_13 = arith.constant dense<0.000000e+00> : vector<16x128xf32>
    %49 = tpu.matmul %46, %48, %cst_13 {dimension_numbers = #tpu.dot_dimension_numbers<[1], [0], [0], [1], [0, 0, 1, 1], [], []>} : vector<16x16xbf16>, vector<16x128xbf16>, vector<16x128xf32> -> vector<16x128xf32>
    %50 = arith.addf %44, %49 : vector<16x128xf32>
    %51 = vector.extract_strided_slice %30 {offsets = [3, 0, 0], sizes = [1, 16, 16], strides = [1, 1, 1]} : vector<8x16x16xbf16> to vector<1x16x16xbf16>
    %52 = vector.shape_cast %51 : vector<1x16x16xbf16> to vector<16x16xbf16>
    %53 = vector.extract_strided_slice %33 {offsets = [3, 0, 0], sizes = [1, 16, 128], strides = [1, 1, 1]} : vector<8x16x128xbf16> to vector<1x16x128xbf16>
    %54 = vector.shape_cast %53 : vector<1x16x128xbf16> to vector<16x128xbf16>
    %cst_14 = arith.constant dense<0.000000e+00> : vector<16x128xf32>
    %55 = tpu.matmul %52, %54, %cst_14 {dimension_numbers = #tpu.dot_dimension_numbers<[1], [0], [0], [1], [0, 0, 1, 1], [], []>} : vector<16x16xbf16>, vector<16x128xbf16>, vector<16x128xf32> -> vector<16x128xf32>
    %56 = arith.addf %50, %55 : vector<16x128xf32>
    %57 = vector.extract_strided_slice %30 {offsets = [4, 0, 0], sizes = [1, 16, 16], strides = [1, 1, 1]} : vector<8x16x16xbf16> to vector<1x16x16xbf16>
    %58 = vector.shape_cast %57 : vector<1x16x16xbf16> to vector<16x16xbf16>
    %59 = vector.extract_strided_slice %33 {offsets = [4, 0, 0], sizes = [1, 16, 128], strides = [1, 1, 1]} : vector<8x16x128xbf16> to vector<1x16x128xbf16>
    %60 = vector.shape_cast %59 : vector<1x16x128xbf16> to vector<16x128xbf16>
    %cst_15 = arith.constant dense<0.000000e+00> : vector<16x128xf32>
    %61 = tpu.matmul %58, %60, %cst_15 {dimension_numbers = #tpu.dot_dimension_numbers<[1], [0], [0], [1], [0, 0, 1, 1], [], []>} : vector<16x16xbf16>, vector<16x128xbf16>, vector<16x128xf32> -> vector<16x128xf32>
    %62 = arith.addf %56, %61 : vector<16x128xf32>
    %63 = vector.extract_strided_slice %30 {offsets = [5, 0, 0], sizes = [1, 16, 16], strides = [1, 1, 1]} : vector<8x16x16xbf16> to vector<1x16x16xbf16>
    %64 = vector.shape_cast %63 : vector<1x16x16xbf16> to vector<16x16xbf16>
    %65 = vector.extract_strided_slice %33 {offsets = [5, 0, 0], sizes = [1, 16, 128], strides = [1, 1, 1]} : vector<8x16x128xbf16> to vector<1x16x128xbf16>
    %66 = vector.shape_cast %65 : vector<1x16x128xbf16> to vector<16x128xbf16>
    %cst_16 = arith.constant dense<0.000000e+00> : vector<16x128xf32>
    %67 = tpu.matmul %64, %66, %cst_16 {dimension_numbers = #tpu.dot_dimension_numbers<[1], [0], [0], [1], [0, 0, 1, 1], [], []>} : vector<16x16xbf16>, vector<16x128xbf16>, vector<16x128xf32> -> vector<16x128xf32>
    %68 = arith.addf %62, %67 : vector<16x128xf32>
    %69 = vector.extract_strided_slice %30 {offsets = [6, 0, 0], sizes = [1, 16, 16], strides = [1, 1, 1]} : vector<8x16x16xbf16> to vector<1x16x16xbf16>
    %70 = vector.shape_cast %69 : vector<1x16x16xbf16> to vector<16x16xbf16>
    %71 = vector.extract_strided_slice %33 {offsets = [6, 0, 0], sizes = [1, 16, 128], strides = [1, 1, 1]} : vector<8x16x128xbf16> to vector<1x16x128xbf16>
    %72 = vector.shape_cast %71 : vector<1x16x128xbf16> to vector<16x128xbf16>
    %cst_17 = arith.constant dense<0.000000e+00> : vector<16x128xf32>
    %73 = tpu.matmul %70, %72, %cst_17 {dimension_numbers = #tpu.dot_dimension_numbers<[1], [0], [0], [1], [0, 0, 1, 1], [], []>} : vector<16x16xbf16>, vector<16x128xbf16>, vector<16x128xf32> -> vector<16x128xf32>
    %74 = arith.addf %68, %73 : vector<16x128xf32>
    %75 = vector.extract_strided_slice %30 {offsets = [7, 0, 0], sizes = [1, 16, 16], strides = [1, 1, 1]} : vector<8x16x16xbf16> to vector<1x16x16xbf16>
    %76 = vector.shape_cast %75 : vector<1x16x16xbf16> to vector<16x16xbf16>
    %77 = vector.extract_strided_slice %33 {offsets = [7, 0, 0], sizes = [1, 16, 128], strides = [1, 1, 1]} : vector<8x16x128xbf16> to vector<1x16x128xbf16>
    %78 = vector.shape_cast %77 : vector<1x16x128xbf16> to vector<16x128xbf16>
    %cst_18 = arith.constant dense<0.000000e+00> : vector<16x128xf32>
    %79 = tpu.matmul %76, %78, %cst_18 {dimension_numbers = #tpu.dot_dimension_numbers<[1], [0], [0], [1], [0, 0, 1, 1], [], []>} : vector<16x16xbf16>, vector<16x128xbf16>, vector<16x128xf32> -> vector<16x128xf32>
    %80 = arith.addf %74, %79 : vector<16x128xf32>
    %c0_19 = arith.constant 0 : index
    %c0_20 = arith.constant 0 : index
    %81 = vector.load %arg5[%c0_19, %c0_20] : memref<1x128xf32, #tpu.memory_space<vmem>>, vector<1x128xf32>
    %82 = vector.broadcast %81 : vector<1x128xf32> to vector<16x128xf32>
    %83 = arith.addf %80, %82 : vector<16x128xf32>
    %c0_21 = arith.constant 0 : index
    %c0_22 = arith.constant 0 : index
    %c0_23 = arith.constant 0 : index
    %84 = vector.load %arg6[%c0_21, %c0_22, %c0_23] : memref<1x16x128xf32, #tpu.memory_space<vmem>>, vector<1x16x128xf32>
    %85 = vector.shape_cast %84 : vector<1x16x128xf32> to vector<16x128xf32>
    %86 = vector.shape_cast %83 : vector<16x128xf32> to vector<1x16x128xf32>
    tpu.vector_store %arg6[%c0_21, %c0_22, %c0_23], %86 {strides = array<i32>} : memref<1x16x128xf32, #tpu.memory_space<vmem>>, vector<1x16x128xf32>,
    return
  }
  func.func @transform_0(%arg0: i32, %arg1: i32) -> (i32, i32, i32) {
    %c0_i32 = arith.constant 0 : i32
    %c0_i32_0 = arith.constant 0 : i32
    %c0_i32_1 = arith.constant 0 : i32
    return %arg0, %c0_i32, %c0_i32_0 : i32, i32, i32
  }
  func.func @transform_1(%arg0: i32, %arg1: i32) -> (i32, i32, i32) {
    %c0_i32 = arith.constant 0 : i32
    %c0_i32_0 = arith.constant 0 : i32
    %c0_i32_1 = arith.constant 0 : i32
    %c0_i32_2 = arith.constant 0 : i32
    return %c0_i32, %c0_i32_0, %c0_i32_1 : i32, i32, i32
  }
  func.func @transform_2(%arg0: i32, %arg1: i32) -> (i32, i32, i32, i32) {
    %c0_i32 = arith.constant 0 : i32
    %c0_i32_0 = arith.constant 0 : i32
    %c0_i32_1 = arith.constant 0 : i32
    %c0_i32_2 = arith.constant 0 : i32
    %c0_i32_3 = arith.constant 0 : i32
    return %c0_i32, %c0_i32_0, %c0_i32_1, %c0_i32_2 : i32, i32, i32, i32
  }
  func.func @transform_3(%arg0: i32, %arg1: i32) -> (i32, i32) {
    %c0_i32 = arith.constant 0 : i32
    %c0_i32_0 = arith.constant 0 : i32
    %c0_i32_1 = arith.constant 0 : i32
    return %c0_i32, %c0_i32_0 : i32, i32
  }
  func.func @transform_4(%arg0: i32, %arg1: i32) -> (i32, i32, i32) {
    %c0_i32 = arith.constant 0 : i32
    %c0_i32_0 = arith.constant 0 : i32
    %c0_i32_1 = arith.constant 0 : i32
    return %arg0, %c0_i32, %c0_i32_0 : i32, i32, i32
  }
}

</mosaic_0001>

<bundles_post_ra>
// kernel: tpu_custom_call.1
= control target key start
LH: loop header
LB: loop body
LE: loop exit
PB: predicated region body
PF: predicated region fallthrough
CT: control target
= control target key end

     0   :  { %9 = vsyncpa [#allocation3], 0  ;;  %s3725_s0 = inlined_call_operand.hbm [shape: bf16[2,16,128], index: 0, kind: input, shape index: {}]   ;;  %s3726_s1 = inlined_call_operand.hbm [shape: bf16[1,384,128], index: 1, kind: input, shape index: {}]   ;;  %s3727_s2 = inlined_call_operand.hbm [shape: bf16[1,8,16,128], index: 2, kind: input, shape index: {}]   ;;  %s3728_s3 = inlined_call_operand.vmem [shape: f32[1,128], index: 3, kind: input, shape index: {}]   ;;  %s3729_s4 = inlined_call_operand.hbm [shape: f32[2,16,128], index: 4, kind: output, shape index: {}]  }
   0x1   :  { %11 = vsyncpa [#allocation3 + $0x1], 0 }
   0x2   :  { %12 = vsyncpa [#allocation6], 0 }
   0x3   :  { %13 = vsyncpa [#allocation4], 0 }
   0x4   :  { %15 = vsyncpa [#allocation4 + $0x1], 0  ;;  %s3188_s15 = smov 0   ;;  %s3190_s16 = smov 0  }
   0x5   :  { %s3192_s17 = smov 0   ;;  %s3194_s18 = smov 0  }
   0x6   :  { %s3196_s19 = smov 0   ;;  %s3198_s20 = smov 0  }
   0x7 LB: > { %s2447_s21 = sadd.s32 4294967295, %s3151_s20   ;;  %s2448_s22 = sadd.s32 4294967294, %s3151_s20   ;;  %s3151_s20 = sphi %s3198_s20, %s21_s20   ;;  %s3147_s19 = sphi %s3196_s19, %s3751_s19   ;;  %s3143_s18 = sphi %s3194_s18, %s3750_s18   ;;  %s3139_s17 = sphi %s3192_s17, %s3749_s17   ;;  %s3135_s16 = sphi %s3190_s16, %s3748_s16   ;;  %s3131_s15 = sphi %s3188_s15, %s3747_s15  }
   0x8   : > { %p53_p0 = scmp.ne.s32.totalorder %s3135_s16, %s3131_s15  ;;  %p3222_p1 = scmp.eq.s32.totalorder %s2447_s21, 0 }
   0x9   : > { %p3226_p2 = scmp.eq.s32.totalorder %s2447_s21, 1  ;;  %p146_p3 = scmp.eq.s32.totalorder %s2448_s22, 1 }
   0xa   : > { %s3734_s23 = scalar_select %p3222_p1, 1, 0 }
   0xb   : > { %p3232_p4 = por %p3222_p1, %p53_p0  ;;  %p2449_p5 = scmp.ge.s32.totalorder %s3151_s20, 1 }
   0xc   : > { %p3237_p6 = por %p146_p3, %p53_p0  ;;  %p153_p7 = scmp.lt.s32.totalorder %s3151_s20, 3 }
   0xd   : > { %s3736_s25 = scalar_select %p3232_p4, 1, 0 }
   0xe   : > { %s3737_s26 = scalar_select %p3237_p6, 1, 0 }
   0xf   : > { %p3242_p8 = pnand %p2449_p5, %p153_p7  ;;  %s3153_s28 = smov [#allocation5]  }
  0x10   : > { %s165_s29 = sshll.u32 %s3153_s28, 4  ;;  %s3154_s5 = smov [#allocation7]   ;;  %s3246_s29 = int_to_ptr.vmem [resolvable:$true] %s165_s29 }
  0x11   : > { %p2805_p9 = pneg %p3242_p8  ;;  %s178_s6 = sshll.u32 %s3154_s5, 4  ;;  %s3257_s6 = int_to_ptr.vmem [resolvable:$true] %s178_s6 }
  0x12   : > { %s2979_s9 = scalar_lea.hbm %s3726_s1, 3072 }
  0x13   : > { %p3253_p11 = pnand %p2805_p9, %p3222_p1  ;;  %p2980_p12 = scmp.ne.s32.totalorder %s3726_s1, %s2979_s9 }
  0x14   : > { %p2986_p5 = scmp.lt.u32.totalorder %s2979_s9, %s3726_s1 }
  0x15   : > { %p2981_p13 = pneg %p3253_p11 }
  0x17   : > { %p2982_p0 = pnand %p2981_p13, %p2980_p12 }
  0x19   : > { %p2983_p3 = pneg %p2982_p0 }
  0x1b   : > { %p2988_p7 = pnand %p2986_p5, %p2983_p3 }
  0x1d   : > { %2991 = shalt.err (!%p2988_p7)
}
  0x1e   : > { %s2992_s14 = scalar_lea.vmem %s3246_s29, 3072  ;;  %p3000_p1 = scmp.lt.s32.totalorder %s3246_s29, %s3246_s29 }
  0x1f   : > { %p2993_p9 = scmp.ne.s32.totalorder %s3246_s29, %s2992_s14  ;;  %p3001_p12 = scmp.lt.s32.totalorder %s2992_s14, %s2992_s14 }
  0x21   : > { %p2995_p10 = pnand %p2993_p9, %p2981_p13  ;;  %p3002_p0 = por %p3001_p12, %p3000_p1 }
  0x23   : > { %p2996_p6 = pneg %p2995_p10 }
  0x25   : > { %p3003_p4 = pnand %p3002_p0, %p2996_p6 }
  0x27   : > { %3006 = shalt.err (!%p3003_p4)
}
  0x28   : > { %s3155_s21 = smov 64   ;;  %s3156_s22 = smov 4  }
  0x29   : > { %2808 = dma.hbm_to_vmem [thread:$0]  (!%p3253_p11), %s3726_s1, 3072, %s3246_s29, [#allocation6], %s3155_s21, %s3155_s21, %s3156_s22  }
  0x2a   : > { %s3007_s9 = scalar_lea.hbm %s3727_s2, 1024 }
  0x2b   : > { %p3008_p1 = scmp.ne.s32.totalorder %s3727_s2, %s3007_s9  ;;  %p3014_p10 = scmp.lt.u32.totalorder %s3007_s9, %s3727_s2 }
  0x2d   : > { %p3010_p4 = pnand %p3008_p1, %p2981_p13 }
  0x2f   : > { %p3011_p6 = pneg %p3010_p4 }
  0x31   : > { %p3016_p3 = pnand %p3014_p10, %p3011_p6 }
  0x33   : > { %3019 = shalt.err (!%p3016_p3)
}
  0x34   : > { %s3020_s29 = scalar_lea.vmem %s3257_s6, 1024  ;;  %p3028_p12 = scmp.lt.s32.totalorder %s3257_s6, %s3257_s6 }
  0x35   : > { %p3021_p5 = scmp.ne.s32.totalorder %s3257_s6, %s3020_s29  ;;  %p3029_p0 = scmp.lt.s32.totalorder %s3020_s29, %s3020_s29 }
  0x37   : > { %p3023_p7 = pnand %p3021_p5, %p2981_p13  ;;  %p3030_p1 = por %p3029_p0, %p3028_p12 }
  0x39   : > { %p3024_p9 = pneg %p3023_p7 }
  0x3b   : > { %p3031_p4 = pnand %p3030_p1, %p3024_p9 }
  0x3d   : > { %3034 = shalt.err (!%p3031_p4)
}
  0x3e   : > { %2811 = dma.hbm_to_vmem [thread:$0]  (!%p3253_p11), %s3727_s2, 1024, %s3257_s6, [#allocation6], %s3155_s21, %s3155_s21, %s3156_s22  }
  0x3f   : > { %s33_s30 = sadd.s32 1, %s3147_s19  ;;  %s40_s5 = sadd.s32 1, %s3139_s17 }
  0x40   : > { %p35_p13 = scmp.ge.s32.totalorder %s33_s30, 2  ;;  %p47_p6 = scmp.ne.s32.totalorder %s3139_s17, %s3135_s16 }
  0x41   : > { %p48_p10 = scmp.eq.s32.totalorder %s3151_s20, 0  ;;  %p2822_p3 = scmp.lt.s32.totalorder %s3151_s20, 2 }
  0x42   : > { %s3753_s30 = smov (%p35_p13, %s33_s30), 0  ;;  %p3327_p7 = por %p3226_p2, %p47_p6 }
  0x43   : > { %p49_p5 = por %p48_p10, %p47_p6  ;;  %s37_s8 = ssub.s32 %s3147_s19, %s3753_s30 }
  0x44   : > { %s3740_s7 = scalar_select %p3327_p7, 1, 0 }
  0x45   : > { %s195_s9 = sand.u32 1, %s3139_s17   ;;  %p38_p9 = scmp.eq.s32.totalorder %s37_s8, 0 }
  0x46   : > { %s2453_s6 = sshll.u32 %s195_s9, 3  ;;  %s2524_s10 = sshll.u32 %s3147_s19, 7 }
  0x47   : > { %s3336_s11 = scalar_select %p38_p9, %s3139_s17, %s40_s5  }
  0x48   : > { %s3341_s29 = scalar_lea.hbm %s3725_s0, %s2524_s10  ;;  %s199_s24 = scalar_lea.vmem [#allocation2], %s2453_s6 }
  0x49   : > { %s206_s14 = sshll.u32 %s199_s24, 4  ;;  %p3345_p2 = pnand %p2822_p3, %p49_p5  ;;  %s3349_s14 = int_to_ptr.vmem [resolvable:$true] %s206_s14 }
  0x4a   : > { %s3351_s5 = scalar_lea.sflag [#allocation3], %s195_s9  ;;  %s3035_s8 = scalar_lea.hbm %s3341_s29, 128 }
  0x4b   : > { %p3036_p11 = scmp.ne.s32.totalorder %s3341_s29, %s3035_s8  ;;  %p3037_p12 = pneg %p3345_p2 }
  0x4c   : > { %s3040_s12 = scalar_lea.hbm %s3725_s0, 256  ;;  %p3041_p4 = scmp.lt.u32.totalorder %s3341_s29, %s3725_s0 }
  0x4d   : > { %p3038_p0 = pnand %p3037_p12, %p3036_p11  ;;  %p3042_p13 = scmp.lt.u32.totalorder %s3040_s12, %s3035_s8 }
  0x4e   : > { %p3044_p10 = scmp.lt.u32.totalorder %s3035_s8, %s3341_s29 }
  0x4f   : > { %p3039_p1 = pneg %p3038_p0  ;;  %p3043_p6 = por %p3042_p13, %p3041_p4 }
  0x51   : > { %p3045_p3 = por %p3044_p10, %p3043_p6 }
  0x53   : > { %p3046_p5 = pnand %p3045_p3, %p3039_p1 }
  0x55   : > { %3049 = shalt.err (!%p3046_p5)
}
  0x56   : > { %s3050_s9 = scalar_lea.vmem %s3349_s14, 128  ;;  %s3157_s6 = smov [#allocation2]  }
  0x57   : > { %p3051_p9 = scmp.ne.s32.totalorder %s3349_s14, %s3050_s9  ;;  %s3055_s10 = sshll.u32 %s3157_s6, 4  ;;  %s3056_s10 = int_to_ptr.vmem [resolvable:$false] %s3055_s10 }
  0x58   : > { %s3057_s13 = scalar_lea.vmem %s3056_s10, 256  ;;  %p3058_p7 = scmp.lt.s32.totalorder %s3349_s14, %s3056_s10 }
  0x59   : > { %p3053_p11 = pnand %p3051_p9, %p3037_p12  ;;  %p3059_p4 = scmp.lt.s32.totalorder %s3057_s13, %s3050_s9 }
  0x5b   : > { %p3054_p0 = pneg %p3053_p11  ;;  %p3060_p13 = por %p3059_p4, %p3058_p7 }
  0x5d   : > { %p3061_p6 = pnand %p3060_p13, %p3054_p0 }
  0x5f   : > { %3064 = shalt.err (!%p3061_p6)
}
  0x60   : > { %2815 = dma.hbm_to_vmem [thread:$0]  (!%p3345_p2), %s3341_s29, 128, %s3349_s14, %s3351_s5, %s3155_s21, %s3155_s21, %s3156_s22  }
  0x61   : > { %218 = sbr.rel (%p3242_p8) target bundleno = 1346 (0x542), region = 36  ;;  %s3385_s8 = sand.u32 (!%p3242_p8), 1, %s3135_s16  }
  0x62   : > { %s2457_s12 = sshll.u32 (!%p3242_p8), %s3385_s8, 3  ;;  %s221_s24 = scalar_lea.sflag (!%p3242_p8), [#allocation3], %s3385_s8 }
  0x63   : > { %s224_s9 = scalar_lea.vmem (!%p3242_p8), [#allocation2], %s2457_s12  ;;  %p3742_p7 = scmp.ne.s32.totalorder (!%p3242_p8), %s3736_s25, 0 }
  0x68   : > { %3118 = dma.done.wait (%p3742_p7), %s221_s24, 128  }
  0x69   : > { %3120 = vsyncadd (%p3742_p7), %s221_s24, 4294967168  ;;  %p3743_p12 = scmp.ne.s32.totalorder %s3734_s23, 0 }
  0x6b   : > { %3122 = dma.done.wait (%p3743_p12), [#allocation6], 4096  }
  0x6c   : > { %3124 = vsyncadd (%p3743_p12), [#allocation6], 4294963200  ;;  %v2882_v0 = vld [vmem:[%s224_s9] sm:$0xff]   ;;  %v2883_v1 = vld [vmem:[#allocation5] sm:$0xff]   ;;  %v3158_v17 = vmov 0.0   ;;  %vm3159_vm0 = vmmov 0  }
  0x6d   : > { %2599 = vmatprep.subr.bf16.mxu0 %v2882_v0  ;;  %2601 = vmatprep.mubr.bf16.mxu0 %v2883_v1  ;;  %v2884_v2 = vld [vmem:[#allocation5 + $0x8] sm:$0xff]   ;;  %v2885_v3 = vld [vmem:[#allocation5 + $0x10] sm:$0xff]   ;;  %v2886_v4 = vld [vmem:[#allocation5 + $0x18] sm:$0xff]   ;;  %vm966_vm1 = vcmask 130048   ;;  %s2460_s23 = sshll.u32 %s3385_s8, 4  ;;  %s2525_s29 = sshll.u32 %s3143_s18, 8 }
  0x6e   : > { %2600 = vmatpush3.bf16.xpose.msra.mxu0 %v2882_v0  ;;  %v2887_v5 = vld [vmem:[#allocation5 + $0x20] sm:$0xff]   ;;  %v2888_v6 = vld [vmem:[#allocation5 + $0x28] sm:$0xff]   ;;  %v2889_v7 = vld [vmem:[#allocation5 + $0x30] sm:$0xff]   ;;  %2649 = vmatprep.subr.bf16.mxu1 %v3158_v17  ;;  %s256_s21 = scalar_lea.vmem [#allocation8], %s2460_s23  ;;  %s3676_s5 = scalar_lea.hbm %s3729_s4, %s2525_s29 }
  0x6f   : > { %v2890_v8 = vld [vmem:[#allocation5 + $0x38] sm:$0xff]   ;;  %v2891_v9 = vld [vmem:[#allocation5 + $0x40] sm:$0xff]   ;;  %v2892_v10 = vld [vmem:[#allocation5 + $0x48] sm:$0xff]   ;;  %2727 = vmatprep.subr.bf16.mxu0 %v3158_v17  ;;  %2651 = vmatprep.mubr.msk.bf16.mxu1 %vm3159_vm0, %v3158_v17  ;;  %s2343_s22 = sshll.u32 %s256_s21, 4  ;;  %s2330_s6 = scalar_lea.sflag [#allocation4], %s3385_s8  ;;  %s3671_s22 = int_to_ptr.vmem [resolvable:$true] %s2343_s22 }
  0x70   : > { %v2893_v11 = vld [vmem:[#allocation5 + $0x50] sm:$0xff]   ;;  %v2894_v12 = vld [vmem:[#allocation5 + $0x58] sm:$0xff]   ;;  %v2895_v13 = vld [vmem:[#allocation5 + $0x60] sm:$0xff]   ;;  %s3065_s10 = scalar_lea.vmem %s3671_s22, 256  ;;  %p3744_p2 = scmp.ne.s32.totalorder %s3740_s7, 0 }
  0x71   : > { %v2896_v14 = vld [vmem:[#allocation5 + $0x68] sm:$0xff]   ;;  %v2897_v15 = vld [vmem:[#allocation5 + $0x70] sm:$0xff]   ;;  %v2898_v16 = vld [vmem:[#allocation5 + $0x78] sm:$0xff]   ;;  %p3066_p8 = scmp.ne.s32.totalorder %s3671_s22, %s3065_s10  ;;  %s3160_s18 = smov [#allocation8]  }
  0x72   : > { %v2899_v58 = vld [vmem:[#allocation5 + $0x80] sm:$0xff]   ;;  %v2900_v59 = vld [vmem:[#allocation5 + $0x88] sm:$0xff]   ;;  %v2901_v60 = vld [vmem:[#allocation5 + $0x90] sm:$0xff]   ;;  %s3069_s13 = sshll.u32 %s3160_s18, 4  ;;  %s3070_s13 = int_to_ptr.vmem [resolvable:$false] %s3069_s13 }
  0x73   : > { %v2902_v61 = vld [vmem:[#allocation5 + $0x98] sm:$0xff]   ;;  %v2903_v62 = vld [vmem:[#allocation5 + $0xa0] sm:$0xff]   ;;  %v2904_v63 = vld [vmem:[#allocation5 + $0xa8] sm:$0xff]   ;;  %p3067_p1 = pnand %p3066_p8, %p3744_p2  ;;  %s3071_s12 = scalar_lea.vmem %s3070_s13, 512 }
  0x74   : > { %v2905_v0 = vld [vmem:[#allocation5 + $0xb0] sm:$0xff]   ;;  %v2906_v1 = vld [vmem:[#allocation5 + $0xb8] sm:$0xff]   ;;  %p3072_p3 = scmp.lt.s32.totalorder %s3671_s22, %s3070_s13  ;;  %p3073_p5 = scmp.lt.s32.totalorder %s3071_s12, %s3065_s10 }
  0x75   : > { %2602 = vmatmul.mubr.bf16.vlgmr.msra.gmra.mrb[0].mxu0 %v2884_v2  ;;  %p3068_p10 = pneg %p3067_p1 }
  0x76   : > { %2605 = vmatprep.mubr.bf16.mxu0 %v2885_v3  ;;  %p3074_p9 = por %p3073_p5, %p3072_p3 }
  0x78   : > { %p3075_p11 = pnand %p3074_p9, %p3068_p10 }
  0x7d   : > { %2606 = vmatmul.mubr.bf16.gmra.mrb[4].mxu0 %v2886_v4 }
  0x7e   : > { %2609 = vmatprep.mubr.bf16.mxu0 %v2887_v5 }
  0x85   : > { %2610 = vmatmul.mubr.bf16.gmra.mrb[8].mxu0 %v2888_v6 }
  0x86   : > { %2613 = vmatprep.mubr.bf16.mxu0 %v2889_v7 }
  0x8d   : > { %2614 = vmatmul.mubr.bf16.gmra.mrb[12].mxu0 %v2890_v8 }
  0x8e   : > { %2617 = vmatprep.mubr.bf16.mxu0 %v2891_v9 }
  0x95   : > { %2618 = vmatmul.mubr.bf16.gmra.mrb[16].mxu0 %v2892_v10 }
  0x96   : > { %2621 = vmatprep.mubr.bf16.mxu0 %v2893_v11 }
  0x9d   : > { %2622 = vmatmul.mubr.bf16.gmra.mrb[20].mxu0 %v2894_v12 }
  0x9e   : > { %2625 = vmatprep.mubr.bf16.mxu0 %v2895_v13 }
  0xa5   : > { %2626 = vmatmul.mubr.bf16.gmra.mrb[24].mxu0 %v2896_v14 }
  0xa6   : > { %2629 = vmatprep.mubr.bf16.mxu0 %v2897_v15 }
  0xad   : > { %2630 = vmatmul.mubr.bf16.gmra.mrb[28].mxu0 %v2898_v16 }
  0xae   : > { %2633 = vmatprep.mubr.bf16.mxu0 %v2899_v58 }
  0xb5   : > { %2634 = vmatmul.mubr.bf16.gmra.mrb[32].mxu0 %v2900_v59 }
  0xb6   : > { %2637 = vmatprep.mubr.bf16.mxu0 %v2901_v60 }
  0xbd   : > { %2638 = vmatmul.mubr.bf16.gmra.mrb[36].mxu0 %v2902_v61 }
  0xbe   : > { %2641 = vmatprep.mubr.bf16.mxu0 %v2903_v62 }
  0xc5   : > { %2642 = vmatmul.mubr.bf16.gmra.mrb[40].mxu0 %v2904_v63 }
  0xc6   : > { %2645 = vmatprep.mubr.bf16.mxu0 %v2905_v0 }
  0xcd   : > { %2646 = vmatmul.mubr.bf16.gmra.mrb[44].mxu0 %v2906_v1 }
  0xce   : > { %2729 = vmatprep.mubr.msk.bf16.mxu0 %vm3159_vm0, %v3158_v17 }
 0x148   : > { %v2603_v18 = vpop.f32.mrb[0].mxu0 }
 0x149   : > { %718 = vxpose.xlu1.b32.start [1/2] (short) (narrow) %v2603_v18, 16  ;;  %v495_v19 = vpop.f32.mrb[1].mxu0 }
 0x14a   : > { %686 = vxpose.xlu0.b32.start [1/2] (short) (narrow) %v495_v19, 16  ;;  %v2604_v20 = vpop.f32.mrb[2].mxu0 }
 0x14b   : > { %v498_v21 = vpop.f32.mrb[3].mxu0 }
 0x14d   : > { %719 = vxpose.xlu1.b32.end [2/2] (short) (narrow) %v2604_v20, 16 }
 0x14e   : > { %687 = vxpose.xlu0.b32.end [2/2] (short) (narrow) %v498_v21, 16 }
 0x150   : > { %v2607_v22 = vpop.f32.mrb[4].mxu0 }
 0x151   : > { %v511_v23 = vpop.f32.mrb[5].mxu0  ;;  %782 = vxpose.xlu1.b32.start [1/2] (short) (narrow) %v2607_v22, 16 }
 0x152   : > { %750 = vxpose.xlu0.b32.start [1/2] (short) (narrow) %v511_v23, 16  ;;  %v2608_v24 = vpop.f32.mrb[6].mxu0 }
 0x153   : > { %v514_v25 = vpop.f32.mrb[7].mxu0 }
 0x155   : > { %783 = vxpose.xlu1.b32.end [2/2] (short) (narrow) %v2608_v24, 16 }
 0x156   : > { %751 = vxpose.xlu0.b32.end [2/2] (short) (narrow) %v514_v25, 16 }
 0x158   : > { %v2611_v26 = vpop.f32.mrb[8].mxu0 }
 0x159   : > { %v527_v27 = vpop.f32.mrb[9].mxu0  ;;  %846 = vxpose.xlu1.b32.start [1/2] (short) (narrow) %v2611_v26, 16 }
 0x15a   : > { %814 = vxpose.xlu0.b32.start [1/2] (short) (narrow) %v527_v27, 16  ;;  %v2612_v28 = vpop.f32.mrb[10].mxu0 }
 0x15b   : > { %v530_v29 = vpop.f32.mrb[11].mxu0 }
 0x15d   : > { %847 = vxpose.xlu1.b32.end [2/2] (short) (narrow) %v2612_v28, 16 }
 0x15e   : > { %815 = vxpose.xlu0.b32.end [2/2] (short) (narrow) %v530_v29, 16 }
 0x160   : > { %v2615_v30 = vpop.f32.mrb[12].mxu0 }
 0x161   : > { %v543_v31 = vpop.f32.mrb[13].mxu0  ;;  %910 = vxpose.xlu1.b32.start [1/2] (short) (narrow) %v2615_v30, 16 }
 0x162   : > { %878 = vxpose.xlu0.b32.start [1/2] (short) (narrow) %v543_v31, 16  ;;  %v2616_v32 = vpop.f32.mrb[14].mxu0 }
 0x163   : > { %v546_v33 = vpop.f32.mrb[15].mxu0 }
 0x165   : > { %911 = vxpose.xlu1.b32.end [2/2] (short) (narrow) %v2616_v32, 16 }
 0x166   : > { %879 = vxpose.xlu0.b32.end [2/2] (short) (narrow) %v546_v33, 16 }
 0x168   : > { %v2619_v34 = vpop.f32.mrb[16].mxu0 }
 0x169   : > { %v559_v35 = vpop.f32.mrb[17].mxu0 }
 0x16a   : > { %v2620_v36 = vpop.f32.mrb[18].mxu0 }
 0x16b   : > { %v951_v37 = vpack.c.bf16 %v2620_v36, %v2619_v34  ;;  %v562_v38 = vpop.f32.mrb[19].mxu0 }
 0x16c   : > { %v950_v39 = vpack.c.bf16 %v562_v38, %v559_v35 }
 0x16e   : > { %2650 = vmatpush3.bf16.msra.mxu1 %v950_v39 }
 0x16f   : > { %2655 = vmatprep.subr.bf16.mxu1 %v3158_v17 }
 0x170   : > { %v2623_v40 = vpop.f32.mrb[20].mxu0 }
 0x171   : > { %v575_v41 = vpop.f32.mrb[21].mxu0 }
 0x172   : > { %v2624_v42 = vpop.f32.mrb[22].mxu0 }
 0x173   : > { %v953_v43 = vpack.c.bf16 %v2624_v42, %v2623_v40  ;;  %v578_v44 = vpop.f32.mrb[23].mxu0 }
 0x174   : > { %v952_v45 = vpack.c.bf16 %v578_v44, %v575_v41 }
 0x178   : > { %v3402_v46 = vpop.f32.mrb[24].mxu0 }
 0x179   : > { %v591_v47 = vpop.f32.mrb[25].mxu0 }
 0x17a   : > { %v2628_v48 = vpop.f32.mrb[26].mxu0 }
 0x17b   : > { %v955_v49 = vpack.c.bf16 %v2628_v48, %v3402_v46  ;;  %v594_v50 = vpop.f32.mrb[27].mxu0 }
 0x17c   : > { %v954_v51 = vpack.c.bf16 %v594_v50, %v591_v47 }
 0x180   : > { %v3405_v52 = vpop.f32.mrb[28].mxu0 }
 0x181   : > { %v3407_v53 = vpop.f32.mrb[29].mxu0 }
 0x182   : > { %v3409_v54 = vpop.f32.mrb[30].mxu0 }
 0x183   : > { %v957_v55 = vpack.c.bf16 %v3409_v54, %v3405_v52  ;;  %v610_v56 = vpop.f32.mrb[31].mxu0 }
 0x184   : > { %v956_v57 = vpack.c.bf16 %v610_v56, %v3407_v53 }
 0x188   : > { %v3450_v27 = vpop.f32.mrb[32].mxu0 }
 0x189   : > { %v623_v28 = vpop.f32.mrb[33].mxu0 }
 0x18a   : > { %v3452_v29 = vpop.f32.mrb[34].mxu0 }
 0x18b   : > { %v959_v30 = vpack.c.bf16 %v3452_v29, %v3450_v27  ;;  %v626_v31 = vpop.f32.mrb[35].mxu0 }
 0x18c   : > { %v958_v32 = vpack.c.bf16 %v626_v31, %v623_v28 }
 0x18e   : > { %v1475_v33 = vsel %vm966_vm1, %v958_v32, 0 }
 0x190   : > { %v3457_v34 = vpop.f32.mrb[36].mxu0 }
 0x191   : > { %v3459_v35 = vpop.f32.mrb[37].mxu0 }
 0x192   : > { %v3462_v36 = vpop.f32.mrb[38].mxu0 }
 0x193   : > { %v3466_v38 = vpop.f32.mrb[39].mxu0 }
 0x194   : > { %v960_v39 = vpack.c.bf16 %v3466_v38, %v3459_v35 }
 0x198   : > { %v2643_v40 = vpop.f32.mrb[40].mxu0 }
 0x199   : > { %v3470_v41 = vpop.f32.mrb[41].mxu0 }
 0x19a   : > { %v2644_v42 = vpop.f32.mrb[42].mxu0 }
 0x19b   : > { %v3472_v44 = vpop.f32.mrb[43].mxu0 }
 0x1c9   : > { %v734_v3 = vpop.trf.xlu1 }
 0x1ca   : > { %v702_v2 = vpop.trf.xlu0 }
 0x1cd   : > { %v735_v6 = vpop.trf.xlu1 }
 0x1ce   : > { %v703_v4 = vpop.trf.xlu0  ;;  %v943_v8 = vpack.c.bf16 %v735_v6, %v734_v3 }
 0x1cf   : > { %v942_v5 = vpack.c.bf16 %v703_v4, %v702_v2 }
 0x1d1   : > { %2652 = vmatmul.mubr.msk.bf16.vlgmr.msra.gmra.mrb[0].mxu1 %vm966_vm1, %v942_v5  ;;  %v798_v10 = vpop.trf.xlu1 }
 0x1d2   : > { %2656 = vmatpush3.bf16.msra.mxu1 %v951_v37  ;;  %2657 = vmatprep.mubr.msk.bf16.mxu1 %vm3159_vm0, %v3158_v17  ;;  %v766_v7 = vpop.trf.xlu0  ;;  %v961_v37 = vpack.c.bf16 %v3462_v36, %v3457_v34 }
 0x1d3   : > { %2661 = vmatprep.subr.bf16.mxu1 %v3158_v17 }
 0x1d5   : > { %v799_v12 = vpop.trf.xlu1 }
 0x1d6   : > { %v767_v9 = vpop.trf.xlu0  ;;  %v945_v14 = vpack.c.bf16 %v799_v12, %v798_v10 }
 0x1d7   : > { %v944_v11 = vpack.c.bf16 %v767_v9, %v766_v7 }
 0x1d9   : > { %2658 = vmatmul.mubr.msk.bf16.vlgmr.msra.gmra.mrb[4].mxu1 %vm966_vm1, %v943_v8  ;;  %v862_v16 = vpop.trf.xlu1 }
 0x1da   : > { %2662 = vmatpush3.bf16.msra.mxu1 %v952_v45  ;;  %2663 = vmatprep.mubr.msk.bf16.mxu1 %vm3159_vm0, %v3158_v17  ;;  %v830_v13 = vpop.trf.xlu0  ;;  %v962_v45 = vpack.c.bf16 %v3472_v44, %v3470_v41 }
 0x1db   : > { %2667 = vmatprep.subr.bf16.mxu1 %v3158_v17 }
 0x1dd   : > { %v863_v19 = vpop.trf.xlu1 }
 0x1de   : > { %v831_v15 = vpop.trf.xlu0  ;;  %v947_v21 = vpack.c.bf16 %v863_v19, %v862_v16 }
 0x1df   : > { %v946_v18 = vpack.c.bf16 %v831_v15, %v830_v13 }
 0x1e1   : > { %2664 = vmatmul.mubr.msk.bf16.vlgmr.msra.gmra.mrb[8].mxu1 %vm966_vm1, %v944_v11  ;;  %v926_v23 = vpop.trf.xlu1 }
 0x1e2   : > { %2668 = vmatpush3.bf16.msra.mxu1 %v953_v43  ;;  %2669 = vmatprep.mubr.msk.bf16.mxu1 %vm3159_vm0, %v3158_v17  ;;  %v894_v20 = vpop.trf.xlu0  ;;  %v963_v43 = vpack.c.bf16 %v2644_v42, %v2643_v40  ;;  %v3542_v42 = vpop.f32.mrb[44].mxu0 }
 0x1e3   : > { %2673 = vmatprep.subr.bf16.mxu1 %v3158_v17 }
 0x1e4   : > { %v1710_v46 = vsel %vm966_vm1, %v963_v43, 0  ;;  %v3544_v43 = vpop.f32.mrb[45].mxu0 }
 0x1e5   : > { %v927_v25 = vpop.trf.xlu1  ;;  %2728 = vmatpush3.bf16.xpose.msra.mxu0 %v1710_v46  ;;  %v3546_v46 = vpop.f32.mrb[46].mxu0 }
 0x1e6   : > { %v895_v22 = vpop.trf.xlu0  ;;  %v949_v26 = vpack.c.bf16 %v927_v25, %v926_v23  ;;  %2739 = vmatprep.subr.bf16.mxu0 %v3158_v17 }
 0x1e7   : > { %v948_v24 = vpack.c.bf16 %v895_v22, %v894_v20 }
 0x1e9   : > { %2670 = vmatmul.mubr.msk.bf16.vlgmr.msra.gmra.mrb[12].mxu1 %vm966_vm1, %v945_v14 }
 0x1ea   : > { %2674 = vmatpush3.bf16.msra.mxu1 %v954_v51  ;;  %2675 = vmatprep.mubr.msk.bf16.mxu1 %vm3159_vm0, %v3158_v17 }
 0x1eb   : > { %2679 = vmatprep.subr.bf16.mxu1 %v3158_v17 }
 0x1f1   : > { %2676 = vmatmul.mubr.msk.bf16.vlgmr.msra.gmra.mrb[16].mxu1 %vm966_vm1, %v946_v18 }
 0x1f2   : > { %2680 = vmatpush3.bf16.msra.mxu1 %v955_v49  ;;  %2681 = vmatprep.mubr.msk.bf16.mxu1 %vm3159_vm0, %v3158_v17 }
 0x1f3   : > { %2685 = vmatprep.subr.bf16.mxu1 %v3158_v17 }
 0x1f9   : > { %2682 = vmatmul.mubr.msk.bf16.vlgmr.msra.gmra.mrb[20].mxu1 %vm966_vm1, %v947_v21 }
 0x1fa   : > { %2686 = vmatpush3.bf16.msra.mxu1 %v956_v57  ;;  %2687 = vmatprep.mubr.msk.bf16.mxu1 %vm3159_vm0, %v3158_v17 }
 0x1fb   : > { %2691 = vmatprep.subr.bf16.mxu1 %v3158_v17 }
 0x201   : > { %2688 = vmatmul.mubr.msk.bf16.vlgmr.msra.gmra.mrb[24].mxu1 %vm966_vm1, %v948_v24 }
 0x202   : > { %2692 = vmatpush3.bf16.msra.mxu1 %v957_v55  ;;  %2693 = vmatprep.mubr.msk.bf16.mxu1 %vm3159_vm0, %v3158_v17 }
 0x203   : > { %2697 = vmatprep.subr.bf16.mxu1 %v3158_v17 }
 0x209   : > { %2694 = vmatmul.mubr.msk.bf16.vlgmr.msra.gmra.mrb[28].mxu1 %vm966_vm1, %v949_v26 }
 0x20a   : > { %2699 = vmatprep.mubr.msk.bf16.mxu1 %vm3159_vm0, %v3158_v17 }
 0x20b   : > { %2698 = vmatpush3.bf16.xpose.msra.mxu1 %v1475_v33 }
 0x20c   : > { %2703 = vmatprep.subr.bf16.mxu1 %v3158_v17 }
 0x2a4   : > { %v3478_v47 = vpop.f32.mrb[0].mxu1 }
 0x2a5   : > { %v2653_v48 = vpop.f32.mrb[1].mxu1  ;;  %v1319_v49 = vsel %vm966_vm1, %v3478_v47, -inf }
 0x2a6   : > { %1320 = vmax.xlane.f32.xlu0 %v1319_v49  ;;  %v3482_v50 = vpop.f32.mrb[2].mxu1  ;;  %v3548_v48 = vpop.f32.mrb[47].mxu0 }
 0x2a7   : > { %v2654_v51 = vpop.f32.mrb[3].mxu1  ;;  %v1322_v52 = vsel %vm966_vm1, %v3482_v50, -inf  ;;  %v964_v49 = vpack.c.bf16 %v3548_v48, %v3544_v43 }
 0x2a8   : > { %1323 = vmax.xlane.f32.xlu1 %v1322_v52  ;;  %v965_v51 = vpack.c.bf16 %v3546_v46, %v3542_v42 }
 0x2ac   : > { %v3486_v53 = vpop.f32.mrb[4].mxu1 }
 0x2ad   : > { %v2659_v54 = vpop.f32.mrb[5].mxu1  ;;  %v1325_v55 = vsel %vm966_vm1, %v3486_v53, -inf }
 0x2ae   : > { %1326 = vmax.xlane.f32.xlu1 %v1325_v55  ;;  %v3490_v56 = vpop.f32.mrb[6].mxu1 }
 0x2af   : > { %v2660_v57 = vpop.f32.mrb[7].mxu1  ;;  %v1328_v58 = vsel %vm966_vm1, %v3490_v56, -inf }
 0x2b2   : > { %1329 = vmax.xlane.f32.xlu1 %v1328_v58 }
 0x2b4   : > { %v3494_v59 = vpop.f32.mrb[8].mxu1 }
 0x2b5   : > { %v2665_v60 = vpop.f32.mrb[9].mxu1  ;;  %v1331_v61 = vsel %vm966_vm1, %v3494_v59, -inf }
 0x2b6   : > { %1332 = vmax.xlane.f32.xlu0 %v1331_v61  ;;  %v3498_v62 = vpop.f32.mrb[10].mxu1 }
 0x2b7   : > { %v2666_v63 = vpop.f32.mrb[11].mxu1  ;;  %v1334_v0 = vsel %vm966_vm1, %v3498_v62, -inf }
 0x2b8   : > { %1335 = vmax.xlane.f32.xlu1 %v1334_v0 }
 0x2bc   : > { %v3502_v1 = vpop.f32.mrb[12].mxu1 }
 0x2bd   : > { %v2671_v2 = vpop.f32.mrb[13].mxu1  ;;  %v1337_v3 = vsel %vm966_vm1, %v3502_v1, -inf }
 0x2be   : > { %1338 = vmax.xlane.f32.xlu0 %v1337_v3  ;;  %v3506_v4 = vpop.f32.mrb[14].mxu1 }
 0x2bf   : > { %v2672_v5 = vpop.f32.mrb[15].mxu1  ;;  %v1340_v6 = vsel %vm966_vm1, %v3506_v4, -inf }
 0x2c0   : > { %1341 = vmax.xlane.f32.xlu1 %v1340_v6 }
 0x2c4   : > { %v3510_v7 = vpop.f32.mrb[16].mxu1 }
 0x2c5   : > { %v2677_v8 = vpop.f32.mrb[17].mxu1  ;;  %v1343_v9 = vsel %vm966_vm1, %v3510_v7, -inf }
 0x2c6   : > { %1344 = vmax.xlane.f32.xlu0 %v1343_v9  ;;  %v3514_v10 = vpop.f32.mrb[18].mxu1 }
 0x2c7   : > { %v2678_v11 = vpop.f32.mrb[19].mxu1  ;;  %v1346_v12 = vsel %vm966_vm1, %v3514_v10, -inf }
 0x2c8   : > { %1347 = vmax.xlane.f32.xlu1 %v1346_v12 }
 0x2cc   : > { %v3518_v13 = vpop.f32.mrb[20].mxu1 }
 0x2cd   : > { %v2683_v14 = vpop.f32.mrb[21].mxu1  ;;  %v1349_v15 = vsel %vm966_vm1, %v3518_v13, -inf }
 0x2ce   : > { %1350 = vmax.xlane.f32.xlu0 %v1349_v15  ;;  %v3522_v16 = vpop.f32.mrb[22].mxu1 }
 0x2cf   : > { %v2684_v18 = vpop.f32.mrb[23].mxu1  ;;  %v1352_v19 = vsel %vm966_vm1, %v3522_v16, -inf }
 0x2d0   : > { %1353 = vmax.xlane.f32.xlu1 %v1352_v19 }
 0x2d4   : > { %v3526_v20 = vpop.f32.mrb[24].mxu1 }
 0x2d5   : > { %v2689_v21 = vpop.f32.mrb[25].mxu1  ;;  %v1355_v22 = vsel %vm966_vm1, %v3526_v20, -inf }
 0x2d6   : > { %1356 = vmax.xlane.f32.xlu0 %v1355_v22  ;;  %v3530_v23 = vpop.f32.mrb[26].mxu1  ;;  %v1569_v21 = vsel %vm966_vm1, %v960_v39, 0 }
 0x2d7   : > { %v2690_v24 = vpop.f32.mrb[27].mxu1  ;;  %v1358_v25 = vsel %vm966_vm1, %v3530_v23, -inf }
 0x2d8   : > { %1359 = vmax.xlane.f32.xlu1 %v1358_v25 }
 0x2dc   : > { %v3534_v26 = vpop.f32.mrb[28].mxu1 }
 0x2dd   : > { %v2695_v28 = vpop.f32.mrb[29].mxu1  ;;  %v1361_v31 = vsel %vm966_vm1, %v3534_v26, -inf }
 0x2de   : > { %1362 = vmax.xlane.f32.xlu0 %v1361_v31  ;;  %v3538_v32 = vpop.f32.mrb[30].mxu1 }
 0x2df   : > { %v2696_v33 = vpop.f32.mrb[31].mxu1  ;;  %v1364_v40 = vsel %vm966_vm1, %v3538_v32, -inf }
 0x2e0   : > { %1365 = vmax.xlane.f32.xlu1 %v1364_v40 }
 0x333   : > { %v1321_v52 = vpop.xlane.xlu0 %1320 }
 0x334   : > { %v1367_v54 = vsub.f32 %v3478_v47, %v1321_v52 }
 0x335   : > { %v1324_v55 = vpop.xlane.xlu1 %1323 }
 0x336   : > { %v1383_v57 = vmul.f32 1.442695, %v1367_v54  ;;  %v1368_v58 = vsub.f32 %v3482_v50, %v1324_v55  ;;  %v1522_v50 = vsel %vm966_vm1, %v959_v30, 0  ;;  %v1616_v55 = vsel %vm966_vm1, %v961_v37, 0 }
 0x338   : > { %v1385_v60 = vmul.f32 1.442695, %v1368_v58  ;;  %2915 = vpow2.f32 %v1383_v57 }
 0x33a   : > { %2917 = vpow2.f32 %v1385_v60 }
 0x33b   : > { %v1327_v61 = vpop.xlane.xlu1 %1326 }
 0x33c   : > { %v1369_v63 = vsub.f32 %v3486_v53, %v1327_v61 }
 0x33e   : > { %v1387_v0 = vmul.f32 1.442695, %v1369_v63 }
 0x33f   : > { %v1330_v2 = vpop.xlane.xlu1 %1329 }
 0x340   : > { %2919 = vpow2.f32 %v1387_v0  ;;  %v1370_v3 = vsub.f32 %v3490_v56, %v1330_v2 }
 0x342   : > { %v1389_v5 = vmul.f32 1.442695, %v1370_v3  ;;  %v2916_v6 = vpop.eup %2915  ;;  %v1663_v3 = vsel %vm966_vm1, %v962_v45, 0 }
 0x343   : > { %v1333_v8 = vpop.xlane.xlu0 %1332  ;;  %v1415_v22 = vsel %vm966_vm1, %v2916_v6, 0.0 }
 0x344   : > { %v2918_v9 = vpop.eup %2917  ;;  %2921 = vpow2.f32 %v1389_v5  ;;  %v1371_v47 = vsub.f32 %v3494_v59, %v1333_v8 }
 0x345   : > { %v1336_v11 = vpop.xlane.xlu1 %1335  ;;  %v1463_v12 = vpack.c.bf16 %v2918_v9, %v2916_v6  ;;  %v1418_v39 = vsel %vm966_vm1, %v2918_v9, 0.0 }
 0x346   : > { %v1391_v53 = vmul.f32 1.442695, %v1371_v47  ;;  %v1372_v14 = vsub.f32 %v3498_v62, %v1336_v11  ;;  %v1757_v11 = vsel %vm966_vm1, %v964_v49, 0  ;;  %v1804_v49 = vsel %vm966_vm1, %v965_v51, 0 }
 0x347   : > { %2700 = vmatmul.mubr.msk.bf16.vlgmr.msra.gmra.mrb[32].mxu1 %vm966_vm1, %v1463_v12 }
 0x348   : > { %2923 = vpow2.f32 %v1391_v53  ;;  %v1393_v56 = vmul.f32 1.442695, %v1372_v14  ;;  %2704 = vmatpush3.bf16.xpose.msra.mxu1 %v1522_v50  ;;  %2705 = vmatprep.mubr.msk.bf16.mxu1 %vm3159_vm0, %v3158_v17 }
 0x349   : > { %2709 = vmatprep.subr.bf16.mxu1 %v3158_v17 }
 0x34a   : > { %v2920_v59 = vpop.eup %2919  ;;  %2925 = vpow2.f32 %v1393_v56 }
 0x34b   : > { %v1339_v27 = vpop.xlane.xlu0 %1338  ;;  %v1421_v29 = vsel %vm966_vm1, %v2920_v59, 0.0 }
 0x34c   : > { %v1373_v30 = vsub.f32 %v3502_v1, %v1339_v27  ;;  %1422 = vadd.xlane.f32.xlu0 %v1421_v29 }
 0x34d   : > { %v1342_v15 = vpop.xlane.xlu1 %1341 }
 0x34e   : > { %v2922_v62 = vpop.eup %2921  ;;  %v1395_v18 = vmul.f32 1.442695, %v1373_v30  ;;  %v1374_v19 = vsub.f32 %v3506_v4, %v1342_v15 }
 0x34f   : > { %v1424_v24 = vsel %vm966_vm1, %v2922_v62, 0.0  ;;  %v1464_v25 = vpack.c.bf16 %v2922_v62, %v2920_v59 }
 0x350   : > { %2927 = vpow2.f32 %v1395_v18  ;;  %v1397_v28 = vmul.f32 1.442695, %v1374_v19  ;;  %1416 = vadd.xlane.f32.xlu0 %v1415_v22  ;;  %1425 = vadd.xlane.f32.xlu1 %v1424_v24  ;;  %v2907_v22 = vld [vmem:[#allocation7] sm:$0xff]   ;;  %v2908_v24 = vld [vmem:[#allocation7 + $0x8] sm:$0xff]  }
 0x351   : > { %2706 = vmatmul.mubr.msk.bf16.vlgmr.msra.gmra.mrb[36].mxu1 %vm966_vm1, %v1464_v25 }
 0x352   : > { %v2924_v1 = vpop.eup %2923  ;;  %2929 = vpow2.f32 %v1397_v28  ;;  %2710 = vmatpush3.bf16.xpose.msra.mxu1 %v1569_v21  ;;  %2711 = vmatprep.mubr.msk.bf16.mxu1 %vm3159_vm0, %v3158_v17 }
 0x353   : > { %v1345_v35 = vpop.xlane.xlu0 %1344  ;;  %v1427_v38 = vsel %vm966_vm1, %v2924_v1, 0.0  ;;  %2715 = vmatprep.subr.bf16.mxu1 %v3158_v17 }
 0x354   : > { %v2926_v4 = vpop.eup %2925  ;;  %v1375_v31 = vsub.f32 %v3510_v7, %v1345_v35  ;;  %1428 = vadd.xlane.f32.xlu0 %v1427_v38  ;;  %1419 = vadd.xlane.f32.xlu1 %v1418_v39 }
 0x355   : > { %v1348_v33 = vpop.xlane.xlu1 %1347  ;;  %v1465_v40 = vpack.c.bf16 %v2926_v4, %v2924_v1  ;;  %v1430_v57 = vsel %vm966_vm1, %v2926_v4, 0.0 }
 0x356   : > { %v1399_v52 = vmul.f32 1.442695, %v1375_v31  ;;  %v1376_v54 = vsub.f32 %v3514_v10, %v1348_v33 }
 0x358   : > { %2931 = vpow2.f32 %v1399_v52  ;;  %v1401_v58 = vmul.f32 1.442695, %v1376_v54  ;;  %1431 = vadd.xlane.f32.xlu1 %v1430_v57 }
 0x359   : > { %2712 = vmatmul.mubr.msk.bf16.vlgmr.msra.gmra.mrb[40].mxu1 %vm966_vm1, %v1465_v40 }
 0x35a   : > { %v2928_v7 = vpop.eup %2927  ;;  %2933 = vpow2.f32 %v1401_v58  ;;  %2716 = vmatpush3.bf16.xpose.msra.mxu1 %v1616_v55  ;;  %2717 = vmatprep.mubr.msk.bf16.mxu1 %vm3159_vm0, %v3158_v17  ;;  %v2910_v55 = vld [vmem:[#allocation7 + $0x18] sm:$0xff]  }
 0x35b   : > { %v1351_v60 = vpop.xlane.xlu0 %1350  ;;  %v1433_v10 = vsel %vm966_vm1, %v2928_v7, 0.0  ;;  %2721 = vmatprep.subr.bf16.mxu1 %v3158_v17 }
 0x35c   : > { %v2930_v34 = vpop.eup %2929  ;;  %v1377_v36 = vsub.f32 %v3518_v13, %v1351_v60  ;;  %1434 = vadd.xlane.f32.xlu0 %v1433_v10 }
 0x35d   : > { %v1354_v37 = vpop.xlane.xlu1 %1353  ;;  %v1436_v61 = vsel %vm966_vm1, %v2930_v34, 0.0  ;;  %v1466_v63 = vpack.c.bf16 %v2930_v34, %v2928_v7 }
 0x35e   : > { %v1403_v0 = vmul.f32 1.442695, %v1377_v36  ;;  %v1378_v2 = vsub.f32 %v3522_v16, %v1354_v37  ;;  %1437 = vadd.xlane.f32.xlu1 %v1436_v61 }
 0x360   : > { %2935 = vpow2.f32 %v1403_v0  ;;  %v1405_v5 = vmul.f32 1.442695, %v1378_v2 }
 0x361   : > { %2718 = vmatmul.mubr.msk.bf16.vlgmr.msra.gmra.mrb[44].mxu1 %vm966_vm1, %v1466_v63 }
 0x362   : > { %v2932_v6 = vpop.eup %2931  ;;  %2937 = vpow2.f32 %v1405_v5  ;;  %2722 = vmatpush3.bf16.xpose.msra.mxu1 %v1663_v3  ;;  %2723 = vmatprep.mubr.msk.bf16.mxu1 %vm3159_vm0, %v3158_v17  ;;  %v2909_v3 = vld [vmem:[#allocation7 + $0x10] sm:$0xff]  }
 0x363   : > { %v1357_v13 = vpop.xlane.xlu0 %1356  ;;  %v1439_v8 = vsel %vm966_vm1, %v2932_v6, 0.0  ;;  %2733 = vmatprep.subr.bf16.mxu1 %v3158_v17 }
 0x364   : > { %v2934_v16 = vpop.eup %2933  ;;  %v1379_v41 = vsub.f32 %v3526_v20, %v1357_v13  ;;  %1440 = vadd.xlane.f32.xlu0 %v1439_v8 }
 0x365   : > { %v1360_v44 = vpop.xlane.xlu1 %1359  ;;  %v1442_v45 = vsel %vm966_vm1, %v2934_v16, 0.0  ;;  %v1467_v9 = vpack.c.bf16 %v2934_v16, %v2932_v6 }
 0x366   : > { %v1407_v47 = vmul.f32 1.442695, %v1379_v41  ;;  %v1380_v50 = vsub.f32 %v3530_v23, %v1360_v44  ;;  %1443 = vadd.xlane.f32.xlu1 %v1442_v45 }
 0x368   : > { %2939 = vpow2.f32 %v1407_v47  ;;  %v1409_v12 = vmul.f32 1.442695, %v1380_v50 }
 0x369   : > { %2724 = vmatmul.mubr.msk.bf16.vlgmr.msra.gmra.mrb[48].mxu1 %vm966_vm1, %v1467_v9 }
 0x36a   : > { %v2936_v53 = vpop.eup %2935  ;;  %2941 = vpow2.f32 %v1409_v12  ;;  %2734 = vmatpush3.bf16.xpose.msra.mxu1 %v1757_v11  ;;  %2735 = vmatprep.mubr.msk.bf16.mxu1 %vm3159_vm0, %v3158_v17  ;;  %v2911_v11 = vld [vmem:[#allocation7 + $0x20] sm:$0xff]  }
 0x36b   : > { %v1363_v20 = vpop.xlane.xlu0 %1362  ;;  %v1445_v14 = vsel %vm966_vm1, %v2936_v53, 0.0  ;;  %2745 = vmatprep.subr.bf16.mxu1 %v3158_v17 }
 0x36c   : > { %v2938_v23 = vpop.eup %2937  ;;  %v1381_v43 = vsub.f32 %v3534_v26, %v1363_v20  ;;  %1446 = vadd.xlane.f32.xlu0 %v1445_v14 }
 0x36d   : > { %v1468_v48 = vpack.c.bf16 %v2938_v23, %v2936_v53  ;;  %v1366_v56 = vpop.xlane.xlu1 %1365  ;;  %v1448_v59 = vsel %vm966_vm1, %v2938_v23, 0.0 }
 0x36e   : > { %v1411_v27 = vmul.f32 1.442695, %v1381_v43  ;;  %v1382_v29 = vsub.f32 %v3538_v32, %v1366_v56  ;;  %1449 = vadd.xlane.f32.xlu1 %v1448_v59 }
 0x36f   : > { %2730 = vmatmul.mubr.msk.bf16.vlgmr.msra.gmra.mrb[48].mxu0 %vm966_vm1, %v1468_v48 }
 0x370   : > { %2943 = vpow2.f32 %v1411_v27  ;;  %v1413_v30 = vmul.f32 1.442695, %v1382_v29  ;;  %2740 = vmatpush3.bf16.xpose.msra.mxu0 %v1804_v49  ;;  %2741 = vmatprep.mubr.msk.bf16.mxu0 %vm3159_vm0, %v3158_v17 }
 0x371   : > { %2751 = vmatprep.subr.bf16.mxu0 %v3158_v17 }
 0x372   : > { %v2940_v26 = vpop.eup %2939  ;;  %2945 = vpow2.f32 %v1413_v30  ;;  %v2912_v30 = vld [vmem:[#allocation7 + $0x28] sm:$0xff]  }
 0x373   : > { %v1451_v42 = vsel %vm966_vm1, %v2940_v26, 0.0 }
 0x374   : > { %v2942_v46 = vpop.eup %2941  ;;  %1452 = vadd.xlane.f32.xlu0 %v1451_v42 }
 0x375   : > { %v1454_v51 = vsel %vm966_vm1, %v2942_v46, 0.0  ;;  %v1469_v32 = vpack.c.bf16 %v2942_v46, %v2940_v26 }
 0x376   : > { %1455 = vadd.xlane.f32.xlu1 %v1454_v51 }
 0x377   : > { %2736 = vmatmul.mubr.msk.bf16.vlgmr.msra.gmra.mrb[52].mxu1 %vm966_vm1, %v1469_v32 }
 0x378   : > { %2747 = vmatprep.mubr.msk.bf16.mxu1 %vm3159_vm0, %v3158_v17  ;;  %2746 = vmatpush3.bf16.msra.mxu1 %v2908_v24  ;;  %v2913_v24 = vld [vmem:[#allocation7 + $0x30] sm:$0xff]  }
 0x379   : > { %2757 = vmatprep.subr.bf16.mxu1 %v3158_v17 }
 0x37a   : > { %v2944_v15 = vpop.eup %2943 }
 0x37b   : > { %v1457_v62 = vsel %vm966_vm1, %v2944_v15, 0.0 }
 0x37c   : > { %v2946_v18 = vpop.eup %2945  ;;  %1458 = vadd.xlane.f32.xlu0 %v1457_v62 }
 0x37d   : > { %v1460_v19 = vsel %vm966_vm1, %v2946_v18, 0.0  ;;  %v1470_v21 = vpack.c.bf16 %v2946_v18, %v2944_v15 }
 0x37e   : > { %1461 = vadd.xlane.f32.xlu1 %v1460_v19 }
 0x37f   : > { %2742 = vmatmul.mubr.msk.bf16.vlgmr.msra.gmra.mrb[52].mxu0 %vm966_vm1, %v1470_v21 }
 0x380   : > { %2753 = vmatprep.mubr.msk.bf16.mxu0 %vm3159_vm0, %v3158_v17  ;;  %2752 = vmatpush3.bf16.msra.mxu0 %v2907_v22 }
 0x381   : > { %2763 = vmatprep.subr.bf16.mxu0 %v3158_v17 }
 0x3d9   : > { %v1423_v25 = vpop.xlane.xlu0 %1422 }
 0x3dd   : > { %v1426_v28 = vpop.xlane.xlu1 %1425  ;;  %v1417_v1 = vpop.xlane.xlu0 %1416 }
 0x3de   : > { %2947 = vrcp.f32 %v1417_v1 }
 0x3e1   : > { %v1420_v35 = vpop.xlane.xlu1 %1419  ;;  %v1429_v58 = vpop.xlane.xlu0 %1428 }
 0x3e2   : > { %2949 = vrcp.f32 %v1420_v35 }
 0x3e3   : > { %2951 = vrcp.f32 %v1423_v25 }
 0x3e4   : > { %2953 = vrcp.f32 %v1426_v28 }
 0x3e5   : > { %v1432_v7 = vpop.xlane.xlu1 %1431  ;;  %2955 = vrcp.f32 %v1429_v58 }
 0x3e6   : > { %2957 = vrcp.f32 %v1432_v7 }
 0x3e8   : > { %v2948_v39 = vpop.eup %2947 }
 0x3e9   : > { %v1435_v2 = vpop.xlane.xlu0 %1434 }
 0x3ea   : > { %2959 = vrcp.f32 %v1435_v2 }
 0x3eb   : > { %v1438_v5 = vpop.xlane.xlu1 %1437 }
 0x3ec   : > { %v2950_v31 = vpop.eup %2949  ;;  %2961 = vrcp.f32 %v1438_v5 }
 0x3ed   : > { %v2952_v10 = vpop.eup %2951 }
 0x3ee   : > { %v2954_v36 = vpop.eup %2953 }
 0x3ef   : > { %v2956_v8 = vpop.eup %2955 }
 0x3f0   : > { %v2958_v41 = vpop.eup %2957 }
 0x3f1   : > { %v1441_v50 = vpop.xlane.xlu0 %1440 }
 0x3f2   : > { %2963 = vrcp.f32 %v1441_v50 }
 0x3f3   : > { %v1444_v12 = vpop.xlane.xlu1 %1443 }
 0x3f4   : > { %2965 = vrcp.f32 %v1444_v12  ;;  %v2960_v14 = vpop.eup %2959 }
 0x3f6   : > { %v2962_v43 = vpop.eup %2961 }
 0x3f9   : > { %v1447_v48 = vpop.xlane.xlu0 %1446 }
 0x3fa   : > { %2967 = vrcp.f32 %v1447_v48 }
 0x3fb   : > { %v1450_v56 = vpop.xlane.xlu1 %1449 }
 0x3fc   : > { %2969 = vrcp.f32 %v1450_v56  ;;  %v2964_v46 = vpop.eup %2963 }
 0x3fe   : > { %v2966_v32 = vpop.eup %2965 }
 0x401   : > { %v1453_v15 = vpop.xlane.xlu0 %1452 }
 0x402   : > { %2971 = vrcp.f32 %v1453_v15 }
 0x403   : > { %v1456_v18 = vpop.xlane.xlu1 %1455 }
 0x404   : > { %2973 = vrcp.f32 %v1456_v18  ;;  %v2968_v1 = vpop.eup %2967 }
 0x41a   : > { %v1511_v38 = vpop.f32.mrb[32].mxu1 }
 0x41b   : > { %v2701_v4 = vpop.f32.mrb[33].mxu1  ;;  %v1863_v40 = vmul.f32 %v2948_v39, %v1511_v38  ;;  %v2970_v38 = vpop.eup %2969 }
 0x41c   : > { %v1514_v33 = vpop.f32.mrb[34].mxu1  ;;  %v2972_v58 = vpop.eup %2971 }
 0x41d   : > { %v1864_v52 = vmul.f32 %v2950_v31, %v1514_v33  ;;  %v2702_v54 = vpop.f32.mrb[35].mxu1 }
 0x41e   : > { %v1462_v54 = vpop.xlane.xlu1 %1461 }
 0x41f   : > { %v1879_v57 = vpack.c.bf16 %v1864_v52, %v1863_v40  ;;  %v1459_v40 = vpop.xlane.xlu0 %1458  ;;  %v2914_v52 = vld [vmem:[#allocation7 + $0x38] sm:$0xff]  }
 0x420   : > { %2975 = vrcp.f32 %v1459_v40 }
 0x421   : > { %2754 = vmatmul.mubr.msk.bf16.vlgmr.msra.gmra.mrb[56].mxu0 %vm966_vm1, %v1879_v57  ;;  %2977 = vrcp.f32 %v1462_v54 }
 0x422   : > { %2764 = vmatpush3.bf16.msra.mxu0 %v2910_v55  ;;  %2765 = vmatprep.mubr.msk.bf16.mxu0 %vm3159_vm0, %v3158_v17 }
 0x423   : > { %2775 = vmatprep.subr.bf16.mxu0 %v3158_v17 }
 0x424   : > { %v1558_v60 = vpop.f32.mrb[36].mxu1 }
 0x425   : > { %v2707_v34 = vpop.f32.mrb[37].mxu1  ;;  %v1865_v61 = vmul.f32 %v2952_v10, %v1558_v60  ;;  %v2974_v60 = vpop.eup %2973 }
 0x426   : > { %v1561_v37 = vpop.f32.mrb[38].mxu1 }
 0x427   : > { %v1866_v63 = vmul.f32 %v2954_v36, %v1561_v37  ;;  %v2708_v0 = vpop.f32.mrb[39].mxu1 }
 0x429   : > { %v1880_v6 = vpack.c.bf16 %v1866_v63, %v1865_v61 }
 0x42a   : > { %v2976_v0 = vpop.eup %2975 }
 0x42b   : > { %2748 = vmatmul.mubr.msk.bf16.vlgmr.msra.gmra.mrb[56].mxu1 %vm966_vm1, %v1880_v6 }
 0x42c   : > { %v1605_v13 = vpop.f32.mrb[40].mxu1  ;;  %2758 = vmatpush3.bf16.msra.mxu1 %v2909_v3  ;;  %2759 = vmatprep.mubr.msk.bf16.mxu1 %vm3159_vm0, %v3158_v17  ;;  %v2978_v3 = vpop.eup %2977 }
 0x42d   : > { %v2713_v16 = vpop.f32.mrb[41].mxu1  ;;  %2769 = vmatprep.subr.bf16.mxu1 %v3158_v17  ;;  %v1867_v45 = vmul.f32 %v2956_v8, %v1605_v13 }
 0x42e   : > { %v1608_v44 = vpop.f32.mrb[42].mxu1 }
 0x42f   : > { %v1868_v9 = vmul.f32 %v2958_v41, %v1608_v44  ;;  %v2714_v47 = vpop.f32.mrb[43].mxu1 }
 0x431   : > { %v1881_v53 = vpack.c.bf16 %v1868_v9, %v1867_v45 }
 0x433   : > { %2760 = vmatmul.mubr.msk.bf16.vlgmr.msra.gmra.mrb[60].mxu1 %vm966_vm1, %v1881_v53 }
 0x434   : > { %v1652_v20 = vpop.f32.mrb[44].mxu1  ;;  %2770 = vmatpush3.bf16.msra.mxu1 %v2911_v11  ;;  %2771 = vmatprep.mubr.msk.bf16.mxu1 %vm3159_vm0, %v3158_v17 }
 0x435   : > { %v2719_v23 = vpop.f32.mrb[45].mxu1  ;;  %2781 = vmatprep.subr.bf16.mxu1 %v3158_v17  ;;  %v1869_v59 = vmul.f32 %v2960_v14, %v1652_v20 }
 0x436   : > { %v1655_v49 = vpop.f32.mrb[46].mxu1 }
 0x437   : > { %v1870_v27 = vmul.f32 %v2962_v43, %v1655_v49  ;;  %v2720_v29 = vpop.f32.mrb[47].mxu1 }
 0x439   : > { %v1882_v26 = vpack.c.bf16 %v1870_v27, %v1869_v59 }
 0x43b   : > { %2766 = vmatmul.mubr.msk.bf16.vlgmr.msra.gmra.mrb[60].mxu0 %vm966_vm1, %v1882_v26 }
 0x43c   : > { %v1699_v42 = vpop.f32.mrb[48].mxu1  ;;  %2776 = vmatpush3.bf16.msra.mxu0 %v2912_v30  ;;  %2777 = vmatprep.mubr.msk.bf16.mxu0 %vm3159_vm0, %v3158_v17 }
 0x43d   : > { %v2725_v51 = vpop.f32.mrb[49].mxu1  ;;  %2787 = vmatprep.subr.bf16.mxu0 %v3158_v17  ;;  %v1871_v19 = vmul.f32 %v2964_v46, %v1699_v42 }
 0x43e   : > { %v1702_v62 = vpop.f32.mrb[50].mxu1 }
 0x43f   : > { %v1872_v21 = vmul.f32 %v2966_v32, %v1702_v62  ;;  %v2726_v22 = vpop.f32.mrb[51].mxu1 }
 0x441   : > { %v1883_v25 = vpack.c.bf16 %v1872_v21, %v1871_v19 }
 0x442   : > { %v1746_v28 = vpop.f32.mrb[48].mxu0 }
 0x443   : > { %v2731_v35 = vpop.f32.mrb[49].mxu0  ;;  %2772 = vmatmul.mubr.msk.bf16.vlgmr.msra.gmra.mrb[64].mxu1 %vm966_vm1, %v1883_v25  ;;  %v1873_v4 = vmul.f32 %v2968_v1, %v1746_v28 }
 0x444   : > { %v1749_v39 = vpop.f32.mrb[50].mxu0  ;;  %2782 = vmatpush3.bf16.msra.mxu1 %v2913_v24  ;;  %2783 = vmatprep.mubr.msk.bf16.mxu1 %vm3159_vm0, %v3158_v17 }
 0x445   : > { %v1874_v31 = vmul.f32 %v2970_v38, %v1749_v39  ;;  %v2732_v33 = vpop.f32.mrb[51].mxu0 }
 0x446   : > { %v2518_v33 = vld [vmem:[%s3728_s3] ss:$0 sm:$0xff] }
 0x447   : > { %v1884_v55 = vpack.c.bf16 %v1874_v31, %v1873_v4 }
 0x449   : > { %2778 = vmatmul.mubr.msk.bf16.vlgmr.msra.gmra.mrb[64].mxu0 %vm966_vm1, %v1884_v55 }
 0x44a   : > { %v1793_v57 = vpop.f32.mrb[52].mxu1  ;;  %2788 = vmatpush3.bf16.msra.mxu0 %v2914_v52  ;;  %2789 = vmatprep.mubr.msk.bf16.mxu0 %vm3159_vm0, %v3158_v17 }
 0x44b   : > { %v2737_v7 = vpop.f32.mrb[53].mxu1  ;;  %v1875_v34 = vmul.f32 %v2972_v58, %v1793_v57 }
 0x44c   : > { %v1796_v10 = vpop.f32.mrb[54].mxu1 }
 0x44d   : > { %v1876_v36 = vmul.f32 %v2974_v60, %v1796_v10  ;;  %v2738_v37 = vpop.f32.mrb[55].mxu1 }
 0x44f   : > { %v1885_v61 = vpack.c.bf16 %v1876_v36, %v1875_v34 }
 0x451   : > { %2784 = vmatmul.mubr.msk.bf16.vlgmr.msra.gmra.mrb[68].mxu1 %vm966_vm1, %v1885_v61 }
 0x452   : > { %v1840_v63 = vpop.f32.mrb[52].mxu0 }
 0x453   : > { %v2743_v2 = vpop.f32.mrb[53].mxu0  ;;  %v1877_v6 = vmul.f32 %v2976_v0, %v1840_v63 }
 0x454   : > { %v1843_v5 = vpop.f32.mrb[54].mxu0 }
 0x455   : > { %v1878_v13 = vmul.f32 %v2978_v3, %v1843_v5  ;;  %v2744_v8 = vpop.f32.mrb[55].mxu0 }
 0x457   : > { %v1886_v16 = vpack.c.bf16 %v1878_v13, %v1877_v6 }
 0x459   : > { %2790 = vmatmul.mubr.msk.bf16.vlgmr.msra.gmra.mrb[68].mxu0 %vm966_vm1, %v1886_v16 }
 0x4f4   : > { %v1999_v17 = vpop.f32.mrb[56].mxu0 }
 0x4f5   : > { %v2755_v41 = vpop.f32.mrb[57].mxu0 }
 0x4f6   : > { %v2002_v44 = vpop.f32.mrb[58].mxu0 }
 0x4f7   : > { %v2756_v45 = vpop.f32.mrb[59].mxu0 }
 0x4fe   : > { %v1949_v9 = vpop.f32.mrb[56].mxu1 }
 0x4ff   : > { %v2000_v47 = vadd.f32 %v1999_v17, %v1949_v9  ;;  %v2749_v50 = vpop.f32.mrb[57].mxu1 }
 0x500   : > { %v1952_v11 = vpop.f32.mrb[58].mxu1 }
 0x501   : > { %v2003_v12 = vadd.f32 %v2002_v44, %v1952_v11  ;;  %v2750_v53 = vpop.f32.mrb[59].mxu1 }
 0x506   : > { %v2049_v20 = vpop.f32.mrb[60].mxu1 }
 0x507   : > { %v2056_v14 = vadd.f32 %v2049_v20, %v2000_v47  ;;  %v2761_v23 = vpop.f32.mrb[61].mxu1 }
 0x508   : > { %v2052_v43 = vpop.f32.mrb[62].mxu1 }
 0x509   : > { %v2057_v48 = vadd.f32 %v2052_v43, %v2003_v12  ;;  %v2762_v49 = vpop.f32.mrb[63].mxu1 }
 0x50e   : > { %v2101_v56 = vpop.f32.mrb[60].mxu0 }
 0x50f   : > { %v2108_v59 = vadd.f32 %v2101_v56, %v2056_v14  ;;  %v2767_v27 = vpop.f32.mrb[61].mxu0 }
 0x510   : > { %v2104_v29 = vpop.f32.mrb[62].mxu0 }
 0x511   : > { %v2109_v30 = vadd.f32 %v2104_v29, %v2057_v48  ;;  %v2768_v26 = vpop.f32.mrb[63].mxu0 }
 0x516   : > { %v2153_v42 = vpop.f32.mrb[64].mxu1 }
 0x517   : > { %v2160_v46 = vadd.f32 %v2153_v42, %v2108_v59  ;;  %v2773_v51 = vpop.f32.mrb[65].mxu1 }
 0x518   : > { %v2156_v32 = vpop.f32.mrb[66].mxu1 }
 0x519   : > { %v2161_v15 = vadd.f32 %v2156_v32, %v2109_v30  ;;  %v2774_v62 = vpop.f32.mrb[67].mxu1 }
 0x51c   : > { %v2205_v18 = vpop.f32.mrb[64].mxu0 }
 0x51d   : > { %v2212_v19 = vadd.f32 %v2205_v18, %v2160_v46  ;;  %v2779_v21 = vpop.f32.mrb[65].mxu0 }
 0x51e   : > { %v2208_v22 = vpop.f32.mrb[66].mxu0 }
 0x51f   : > { %v2213_v24 = vadd.f32 %v2208_v22, %v2161_v15  ;;  %v2780_v25 = vpop.f32.mrb[67].mxu0 }
 0x524   : > { %v2257_v28 = vpop.f32.mrb[68].mxu1 }
 0x525   : > { %v2264_v1 = vadd.f32 %v2257_v28, %v2212_v19  ;;  %v2785_v35 = vpop.f32.mrb[69].mxu1 }
 0x526   : > { %v2260_v38 = vpop.f32.mrb[70].mxu1 }
 0x527   : > { %v2265_v39 = vadd.f32 %v2260_v38, %v2213_v24  ;;  %v2786_v4 = vpop.f32.mrb[71].mxu1 }
 0x52c   : > { %v2309_v31 = vpop.f32.mrb[68].mxu0 }
 0x52d   : > { %v2316_v40 = vadd.f32 %v2309_v31, %v2264_v1  ;;  %v2791_v52 = vpop.f32.mrb[69].mxu0 }
 0x52e   : > { %v2312_v54 = vpop.f32.mrb[70].mxu0 }
 0x52f   : > { %v2325_v55 = vadd.f32 %v2518_v33, %v2316_v40  ;;  %v2317_v57 = vadd.f32 %v2312_v54, %v2265_v39  ;;  %v2792_v58 = vpop.f32.mrb[71].mxu0 }
 0x531   : > { %2327 = vst [vmem:[%s256_s21] sm:$0xff] %v2325_v55  ;;  %v2326_v7 = vadd.f32 %v2518_v33, %v2317_v57 }
 0x533   : > { %2328 = vst [vmem:[%s256_s21 + $0x8] sm:$0xff] %v2326_v7 }
 0x534   : > { %3078 = shalt.err (!%p3075_p11)
}
 0x535   : > { %s3079_s24 = scalar_lea.hbm %s3676_s5, 256  ;;  %s3083_s25 = scalar_lea.hbm %s3729_s4, 512 }
 0x536   : > { %p3080_p0 = scmp.ne.s32.totalorder %s3676_s5, %s3079_s24  ;;  %p3084_p6 = scmp.lt.u32.totalorder %s3676_s5, %s3729_s4 }
 0x537   : > { %p3085_p7 = scmp.lt.u32.totalorder %s3083_s25, %s3079_s24  ;;  %p3087_p8 = scmp.lt.u32.totalorder %s3079_s24, %s3676_s5 }
 0x538   : > { %p3081_p4 = pnand %p3080_p0, %p3744_p2 }
 0x539   : > { %p3086_p12 = por %p3085_p7, %p3084_p6 }
 0x53a   : > { %p3082_p13 = pneg %p3081_p4 }
 0x53b   : > { %p3088_p1 = por %p3087_p8, %p3086_p12 }
 0x53d   : > { %p3089_p10 = pnand %p3088_p1, %p3082_p13 }
 0x53f   : > { %3092 = shalt.err (!%p3089_p10)
}
 0x540   : > { %s3161_s29 = smov 128   ;;  %s3162_s14 = smov 8  }
 0x541   : > { %2803 = dma.vmem_to_hbm [thread:$0]  (%p3744_p2), %s3671_s22, 256, %s3676_s5, %s2330_s6, %s3161_s29, %s3161_s29, %s3162_s14  }
 0x542 PF: > { %s2358_s28 = sand.u32 1, %s3131_s15   ;;  %p3745_p3 = scmp.ne.s32.totalorder %s3737_s26, 0 }
 0x543   : > { %p3746_p5 = scmp.ge.s32.totalorder %s3151_s20, 2  ;;  %s2359_s10 = scalar_lea.sflag [#allocation4], %s2358_s28 }
 0x545   : > { %p2817_p9 = pnand %p3746_p5, %p3745_p3 }
 0x547   : > { %3126 = dma.done.wait (!%p2817_p9), %s2359_s10, 256  }
 0x548   : > { %3128 = vsyncadd (!%p2817_p9), %s2359_s10, 4294967040  ;;  %s21_s20 = sadd.s32 1, %s3151_s20   ;;  %s3747_s15 = smov %s3135_s16 }
 0x549   : > { %p18_p11 = scmp.ge.s32.totalorder %s21_s20, 4   ;;  %s3748_s16 = smov %s3139_s17 }
 0x54a   : > { %s3749_s17 = smov %s3336_s11  ;;  %s3750_s18 = smov %s3147_s19 }
 0x54b   : > { %s3751_s19 = smov %s3753_s30  ;;  %20 = sbr.rel (!%p18_p11) target bundleno = 7 (0x7), region = 91 }
 0x552   :  { %2364 = vsyncpa [#allocation3], 1 }
 0x553   :  { %2366 = vsyncpa [#allocation3 + $0x1], 1 }
 0x554   :  { %2367 = vsyncpa [#allocation6], 1 }
 0x555   :  { %2368 = vsyncpa [#allocation4], 1 }
 0x556   :  { %2370 = vsyncpa [#allocation4 + $0x1], 1 }

</bundles_post_ra>
